<compile_context>
chip_gen: v5e
topology: v5e:2x2
jax: 0.10.0
libtpu: 0.0.40
codegen_flags: <defaults>
</compile_context>

<pallas_src>
import functools

import jax
import jax.numpy as jnp
from jax import lax
from jax.experimental import pallas as pl
from jax.experimental.pallas import tpu as pltpu  # noqa: F401  (TPU backend)


def gae_kernel(x_ref, adj_ref, f_ref,
               w1_ref, b1_ref, w2_ref, b2_ref,
               w3_ref, b3_ref, w4_ref, b4_ref,
               loss_ref, *, num_graphs, nodes_per_graph):
    B, N = num_graphs, nodes_per_graph
    BN = B * N
    f32, bf16 = jnp.float32, jnp.bfloat16

    def mm(a, b):
        # bf16 x bf16 -> f32 accumulate on the MXU; weights already (in, out).
        return jnp.dot(a, b, preferred_element_type=f32)

    x = x_ref[...]          # (B*N, n_in)   bf16
    adj = adj_ref[...]      # (B*N, B*N)    bf16, block-diagonal over graphs

    # --- encoder: GCN layer 1: relu(adj @ (X @ W1) + b1) ---
    h = mm(x, w1_ref[...])
    h = jnp.maximum(mm(adj, h.astype(bf16)) + b1_ref[...], 0.0)

    # --- encoder: GCN layer 2: relu(adj @ (h1 @ W2) + b2)  (reps) ---
    h = mm(h.astype(bf16), w2_ref[...])
    h = jnp.maximum(mm(adj, h.astype(bf16)) + b2_ref[...], 0.0)

    # --- decoder: dc1 + act ---
    h = jnp.maximum(mm(h.astype(bf16), w3_ref[...]) + b3_ref[...], 0.0)

    # --- decoder: dc2 + act ---
    r = jnp.maximum(mm(h.astype(bf16), w4_ref[...]) + b4_ref[...], 0.0)

    # --- per-graph Frobenius norm of (reft - F), sqrt done in-kernel (EUP) ---
    d = r - f_ref[...]                                     # (B*N, n_h4) f32
    row_sq = jnp.sum(d * d, axis=1, keepdims=True)         # (B*N, 1)
    rows = lax.broadcasted_iota(jnp.int32, (BN, 1), 0)     # node -> row index
    out_row = lax.broadcasted_iota(jnp.int32, (B, 1), 0)   # output row index

    losses = jnp.zeros((B, 1), f32)
    for b in range(B):                                     # tiny static unroll
        mask_b = (rows >= b * N) & (rows < (b + 1) * N)
        s_b = jnp.sum(jnp.where(mask_b, row_sq, 0.0), axis=0, keepdims=True)
        losses = jnp.where(out_row == b, s_b, losses)

    loss_ref[...] = jnp.sqrt(losses)                       # single (B,1) store


@jax.jit
def gae_forward_batched(X, adj, F, params):
    """Fused batched GAE forward.

    X:(B,N,n_in), adj:(B,N,N), F:(B,N,n_h4). params = ((w1,b1),...,(w4,b4))
    with weights pre-transposed to (in, out) and biases shaped (1, out).
    Returns the per-graph Frobenius reconstruction loss, shape (B,).
    """
    (w1, b1), (w2, b2), (w3, b3), (w4, b4) = params
    B, N, n_in = X.shape
    BN = B * N
    n_h1, n_h2, n_h3, n_h4 = w1.shape[1], w2.shape[1], w3.shape[1], w4.shape[1]

    bf16 = jnp.bfloat16
    # bf16 for every MXU operand; F / biases stay f32 for the elementwise math.
    x_flat = X.reshape(BN, n_in).astype(bf16)
    f_flat = F.reshape(BN, n_h4).astype(jnp.float32)
    adj_bd = jax.scipy.linalg.block_diag(
        *[adj[b] for b in range(B)]).astype(bf16)            # (BN, BN)

    ws = [w.astype(bf16) for w in (w1, w2, w3, w4)]
    bs = [b.astype(jnp.float32) for b in (b1, b2, b3, b4)]

    flops = 2 * BN * (n_in * n_h1 + BN * n_h1 +
                      n_h1 * n_h2 + BN * n_h2 +
                      n_h2 * n_h3 + n_h3 * n_h4)
    bytes_accessed = (2 * (x_flat.size + adj_bd.size + sum(w.size for w in ws))
                      + 4 * (f_flat.size + sum(b.size for b in bs) + B))

    kernel = functools.partial(gae_kernel, num_graphs=B, nodes_per_graph=N)

    # Single invocation, no grid: every operand is a full-array VMEM block.
    losses = pl.pallas_call(
        kernel,
        out_shape=jax.ShapeDtypeStruct((B, 1), jnp.float32),
        cost_estimate=pl.CostEstimate(flops=flops, transcendentals=B,
                                      bytes_accessed=bytes_accessed),
    )(x_flat, adj_bd, f_flat,
      ws[0], bs[0], ws[1], bs[1], ws[2], bs[2], ws[3], bs[3])

    return losses[:, 0]


# ----------------------------------------------------------------------------
# Parameter construction (transpose + bias reshape hoisted here, done once)
# and a pure-JAX f32 reference mirroring the PyTorch forward.
# ----------------------------------------------------------------------------
def xavier_uniform(key, out_dim, in_dim):
    bound = (6.0 / (in_dim + out_dim)) ** 0.5
    return jax.random.uniform(key, (out_dim, in_dim), jnp.float32, -bound, bound)


def init_params(key, n_in, n_h1, n_h2, n_h3, n_h4):
    dims = [(n_h1, n_in), (n_h2, n_h1), (n_h3, n_h2), (n_h4, n_h3)]
    keys = jax.random.split(key, 4)
    params = []
    for k, (o, i) in zip(keys, dims):
        # torch: xavier_uniform_(weight (out,in)), bias.fill_(0.0).
        # Pre-transpose ONCE to (in, out) so the kernel does plain `a @ w`.
        w = xavier_uniform(k, o, i).T
        params.append((w, jnp.zeros((1, o), jnp.float32)))
    return params


def reference_forward(X, adj, F, params):
    """Per-graph f32 reference (mirrors the PyTorch forward)."""
    (w1, b1), (w2, b2), (w3, b3), (w4, b4) = params
    relu = lambda z: jnp.maximum(z, 0.0)
    h = relu(adj @ (X @ w1) + b1)
    h = relu(adj @ (h @ w2) + b2)
    h = relu(h @ w3 + b3)
    r = relu(h @ w4 + b4)
    return jnp.sqrt(jnp.sum((r - F) ** 2))


if __name__ == "__main__":
    # args: n_in=32, n_h1=32, n_h2=16, n_h3=16, n_h4=8, act='relu'
    # B=4 graphs of N=64 nodes fused into a single pallas_call.
    B, N, n_in, n_h1, n_h2, n_h3, n_h4 = 4, 64, 32, 32, 16, 16, 8

    key = jax.random.PRNGKey(0)
    kx, ka, kf, kp = jax.random.split(key, 4)

    X = jax.random.normal(kx, (B, N, n_in), jnp.float32)

    # symmetric, row-normalized dense adjacency per graph (deterministic)
    A = (jax.random.uniform(ka, (B, N, N)) > 0.8).astype(jnp.float32)
    A = A + jnp.swapaxes(A, 1, 2) + jnp.eye(N, dtype=jnp.float32)[None]
    adj = A / jnp.sum(A, axis=2, keepdims=True)

    F = 0.1 * jax.random.normal(kf, (B, N, n_h4), jnp.float32)

    params = init_params(kp, n_in, n_h1, n_h2, n_h3, n_h4)

    loss = jax.block_until_ready(gae_forward_batched(X, adj, F, params))
    ref = jnp.stack([reference_forward(X[b], adj[b], F[b], params)
                     for b in range(B)])
    ref = jax.block_until_ready(ref)

    assert loss.shape == (B,), loss.shape
    # bf16 matmul inputs with f32 accumulation: loosened tolerance per review.
    assert jnp.allclose(loss, ref, rtol=2e-2, atol=1e-2), (loss, ref)
    print("KERNEL_OK")
</pallas_src>

<mosaic_0001>
module attributes {stable_mosaic.version = 11 : i64} {
  func.func @gae_kernel(%arg0: memref<256x32xbf16, #tpu.memory_space<vmem>>, %arg1: memref<256x256xbf16, #tpu.memory_space<vmem>>, %arg2: memref<256x8xf32, #tpu.memory_space<vmem>>, %arg3: memref<32x32xbf16, #tpu.memory_space<vmem>>, %arg4: memref<1x32xf32, #tpu.memory_space<vmem>>, %arg5: memref<32x16xbf16, #tpu.memory_space<vmem>>, %arg6: memref<1x16xf32, #tpu.memory_space<vmem>>, %arg7: memref<16x16xbf16, #tpu.memory_space<vmem>>, %arg8: memref<1x16xf32, #tpu.memory_space<vmem>>, %arg9: memref<16x8xbf16, #tpu.memory_space<vmem>>, %arg10: memref<1x8xf32, #tpu.memory_space<vmem>>, %arg11: memref<4x1xf32, #tpu.memory_space<vmem>>) attributes {dimension_semantics = [], scalar_prefetch = 0 : i64, scratch_operands = 0 : i64, tpu.core_type = #tpu.core_type<tc>} {
    %c0 = arith.constant 0 : index
    %c0_0 = arith.constant 0 : index
    %0 = vector.load %arg0[%c0, %c0_0] : memref<256x32xbf16, #tpu.memory_space<vmem>>, vector<256x32xbf16>
    %c0_1 = arith.constant 0 : index
    %c0_2 = arith.constant 0 : index
    %1 = vector.load %arg1[%c0_1, %c0_2] : memref<256x256xbf16, #tpu.memory_space<vmem>>, vector<256x256xbf16>
    %c0_3 = arith.constant 0 : index
    %c0_4 = arith.constant 0 : index
    %2 = vector.load %arg3[%c0_3, %c0_4] : memref<32x32xbf16, #tpu.memory_space<vmem>>, vector<32x32xbf16>
    %cst = arith.constant dense<0.000000e+00> : vector<256x32xf32>
    %3 = tpu.matmul %0, %2, %cst {dimension_numbers = #tpu.dot_dimension_numbers<[1], [0], [0], [1], [0, 0, 1, 1], [], []>} : vector<256x32xbf16>, vector<32x32xbf16>, vector<256x32xf32> -> vector<256x32xf32>
    %4 = arith.truncf %3 : vector<256x32xf32> to vector<256x32xbf16>
    %cst_5 = arith.constant dense<0.000000e+00> : vector<256x32xf32>
    %5 = tpu.matmul %1, %4, %cst_5 {dimension_numbers = #tpu.dot_dimension_numbers<[1], [0], [0], [1], [0, 0, 1, 1], [], []>} : vector<256x256xbf16>, vector<256x32xbf16>, vector<256x32xf32> -> vector<256x32xf32>
    %c0_6 = arith.constant 0 : index
    %c0_7 = arith.constant 0 : index
    %6 = vector.load %arg4[%c0_6, %c0_7] : memref<1x32xf32, #tpu.memory_space<vmem>>, vector<1x32xf32>
    %7 = vector.broadcast %6 : vector<1x32xf32> to vector<256x32xf32>
    %8 = arith.addf %5, %7 : vector<256x32xf32>
    %cst_8 = arith.constant 0.000000e+00 : f32
    %9 = vector.broadcast %cst_8 : f32 to vector<256x32xf32>
    %10 = arith.maximumf %8, %9 : vector<256x32xf32>
    %11 = arith.truncf %10 : vector<256x32xf32> to vector<256x32xbf16>
    %c0_9 = arith.constant 0 : index
    %c0_10 = arith.constant 0 : index
    %12 = vector.load %arg5[%c0_9, %c0_10] : memref<32x16xbf16, #tpu.memory_space<vmem>>, vector<32x16xbf16>
    %cst_11 = arith.constant dense<0.000000e+00> : vector<256x16xf32>
    %13 = tpu.matmul %11, %12, %cst_11 {dimension_numbers = #tpu.dot_dimension_numbers<[1], [0], [0], [1], [0, 0, 1, 1], [], []>} : vector<256x32xbf16>, vector<32x16xbf16>, vector<256x16xf32> -> vector<256x16xf32>
    %14 = arith.truncf %13 : vector<256x16xf32> to vector<256x16xbf16>
    %cst_12 = arith.constant dense<0.000000e+00> : vector<256x16xf32>
    %15 = tpu.matmul %1, %14, %cst_12 {dimension_numbers = #tpu.dot_dimension_numbers<[1], [0], [0], [1], [0, 0, 1, 1], [], []>} : vector<256x256xbf16>, vector<256x16xbf16>, vector<256x16xf32> -> vector<256x16xf32>
    %c0_13 = arith.constant 0 : index
    %c0_14 = arith.constant 0 : index
    %16 = vector.load %arg6[%c0_13, %c0_14] : memref<1x16xf32, #tpu.memory_space<vmem>>, vector<1x16xf32>
    %17 = vector.broadcast %16 : vector<1x16xf32> to vector<256x16xf32>
    %18 = arith.addf %15, %17 : vector<256x16xf32>
    %cst_15 = arith.constant 0.000000e+00 : f32
    %19 = vector.broadcast %cst_15 : f32 to vector<256x16xf32>
    %20 = arith.maximumf %18, %19 : vector<256x16xf32>
    %21 = arith.truncf %20 : vector<256x16xf32> to vector<256x16xbf16>
    %c0_16 = arith.constant 0 : index
    %c0_17 = arith.constant 0 : index
    %22 = vector.load %arg7[%c0_16, %c0_17] : memref<16x16xbf16, #tpu.memory_space<vmem>>, vector<16x16xbf16>
    %cst_18 = arith.constant dense<0.000000e+00> : vector<256x16xf32>
    %23 = tpu.matmul %21, %22, %cst_18 {dimension_numbers = #tpu.dot_dimension_numbers<[1], [0], [0], [1], [0, 0, 1, 1], [], []>} : vector<256x16xbf16>, vector<16x16xbf16>, vector<256x16xf32> -> vector<256x16xf32>
    %c0_19 = arith.constant 0 : index
    %c0_20 = arith.constant 0 : index
    %24 = vector.load %arg8[%c0_19, %c0_20] : memref<1x16xf32, #tpu.memory_space<vmem>>, vector<1x16xf32>
    %25 = vector.broadcast %24 : vector<1x16xf32> to vector<256x16xf32>
    %26 = arith.addf %23, %25 : vector<256x16xf32>
    %cst_21 = arith.constant 0.000000e+00 : f32
    %27 = vector.broadcast %cst_21 : f32 to vector<256x16xf32>
    %28 = arith.maximumf %26, %27 : vector<256x16xf32>
    %29 = arith.truncf %28 : vector<256x16xf32> to vector<256x16xbf16>
    %c0_22 = arith.constant 0 : index
    %c0_23 = arith.constant 0 : index
    %30 = vector.load %arg9[%c0_22, %c0_23] : memref<16x8xbf16, #tpu.memory_space<vmem>>, vector<16x8xbf16>
    %cst_24 = arith.constant dense<0.000000e+00> : vector<256x8xf32>
    %31 = tpu.matmul %29, %30, %cst_24 {dimension_numbers = #tpu.dot_dimension_numbers<[1], [0], [0], [1], [0, 0, 1, 1], [], []>} : vector<256x16xbf16>, vector<16x8xbf16>, vector<256x8xf32> -> vector<256x8xf32>
    %c0_25 = arith.constant 0 : index
    %c0_26 = arith.constant 0 : index
    %32 = vector.load %arg10[%c0_25, %c0_26] : memref<1x8xf32, #tpu.memory_space<vmem>>, vector<1x8xf32>
    %33 = vector.broadcast %32 : vector<1x8xf32> to vector<256x8xf32>
    %34 = arith.addf %31, %33 : vector<256x8xf32>
    %cst_27 = arith.constant 0.000000e+00 : f32
    %35 = vector.broadcast %cst_27 : f32 to vector<256x8xf32>
    %36 = arith.maximumf %34, %35 : vector<256x8xf32>
    %c0_28 = arith.constant 0 : index
    %c0_29 = arith.constant 0 : index
    %37 = vector.load %arg2[%c0_28, %c0_29] : memref<256x8xf32, #tpu.memory_space<vmem>>, vector<256x8xf32>
    %38 = arith.subf %36, %37 : vector<256x8xf32>
    %39 = arith.mulf %38, %38 : vector<256x8xf32>
    %cst_30 = arith.constant dense<0.000000e+00> : vector<256xf32>
    %40 = vector.multi_reduction <add>, %39, %cst_30 [1] : vector<256x8xf32> to vector<256xf32>
    %41 = vector.shape_cast %40 : vector<256xf32> to vector<256x1xf32>
    %42 = tpu.iota {dimensions = array<i32: 0>} : vector<256x1xi32>
    %43 = tpu.iota {dimensions = array<i32: 0>} : vector<4x1xi32>
    %cst_31 = arith.constant 0.000000e+00 : f32
    %44 = vector.broadcast %cst_31 : f32 to vector<4x1xf32>
    %c0_i32 = arith.constant 0 : i32
    %45 = vector.broadcast %c0_i32 : i32 to vector<256x1xi32>
    %46 = arith.cmpi sge, %42, %45 : vector<256x1xi32>
    %c64_i32 = arith.constant 64 : i32
    %47 = vector.broadcast %c64_i32 : i32 to vector<256x1xi32>
    %48 = arith.cmpi slt, %42, %47 : vector<256x1xi32>
    %49 = arith.andi %46, %48 : vector<256x1xi1>
    %cst_32 = arith.constant 0.000000e+00 : f32
    %50 = vector.broadcast %cst_32 : f32 to vector<256x1xf32>
    %51 = arith.select %49, %41, %50 : vector<256x1xi1>, vector<256x1xf32>
    %cst_33 = arith.constant dense<0.000000e+00> : vector<1xf32>
    %52 = vector.multi_reduction <add>, %51, %cst_33 [0] : vector<256x1xf32> to vector<1xf32>
    %53 = vector.shape_cast %52 : vector<1xf32> to vector<1x1xf32>
    %c0_i32_34 = arith.constant 0 : i32
    %54 = vector.broadcast %c0_i32_34 : i32 to vector<4x1xi32>
    %55 = arith.cmpi eq, %43, %54 : vector<4x1xi32>
    %56 = vector.shape_cast %53 : vector<1x1xf32> to vector<1x1xf32>
    %57 = vector.broadcast %56 : vector<1x1xf32> to vector<4x1xf32>
    %58 = arith.select %55, %57, %44 : vector<4x1xi1>, vector<4x1xf32>
    %c64_i32_35 = arith.constant 64 : i32
    %59 = vector.broadcast %c64_i32_35 : i32 to vector<256x1xi32>
    %60 = arith.cmpi sge, %42, %59 : vector<256x1xi32>
    %c128_i32 = arith.constant 128 : i32
    %61 = vector.broadcast %c128_i32 : i32 to vector<256x1xi32>
    %62 = arith.cmpi slt, %42, %61 : vector<256x1xi32>
    %63 = arith.andi %60, %62 : vector<256x1xi1>
    %cst_36 = arith.constant 0.000000e+00 : f32
    %64 = vector.broadcast %cst_36 : f32 to vector<256x1xf32>
    %65 = arith.select %63, %41, %64 : vector<256x1xi1>, vector<256x1xf32>
    %cst_37 = arith.constant dense<0.000000e+00> : vector<1xf32>
    %66 = vector.multi_reduction <add>, %65, %cst_37 [0] : vector<256x1xf32> to vector<1xf32>
    %67 = vector.shape_cast %66 : vector<1xf32> to vector<1x1xf32>
    %c1_i32 = arith.constant 1 : i32
    %68 = vector.broadcast %c1_i32 : i32 to vector<4x1xi32>
    %69 = arith.cmpi eq, %43, %68 : vector<4x1xi32>
    %70 = vector.shape_cast %67 : vector<1x1xf32> to vector<1x1xf32>
    %71 = vector.broadcast %70 : vector<1x1xf32> to vector<4x1xf32>
    %72 = arith.select %69, %71, %58 : vector<4x1xi1>, vector<4x1xf32>
    %c128_i32_38 = arith.constant 128 : i32
    %73 = vector.broadcast %c128_i32_38 : i32 to vector<256x1xi32>
    %74 = arith.cmpi sge, %42, %73 : vector<256x1xi32>
    %c192_i32 = arith.constant 192 : i32
    %75 = vector.broadcast %c192_i32 : i32 to vector<256x1xi32>
    %76 = arith.cmpi slt, %42, %75 : vector<256x1xi32>
    %77 = arith.andi %74, %76 : vector<256x1xi1>
    %cst_39 = arith.constant 0.000000e+00 : f32
    %78 = vector.broadcast %cst_39 : f32 to vector<256x1xf32>
    %79 = arith.select %77, %41, %78 : vector<256x1xi1>, vector<256x1xf32>
    %cst_40 = arith.constant dense<0.000000e+00> : vector<1xf32>
    %80 = vector.multi_reduction <add>, %79, %cst_40 [0] : vector<256x1xf32> to vector<1xf32>
    %81 = vector.shape_cast %80 : vector<1xf32> to vector<1x1xf32>
    %c2_i32 = arith.constant 2 : i32
    %82 = vector.broadcast %c2_i32 : i32 to vector<4x1xi32>
    %83 = arith.cmpi eq, %43, %82 : vector<4x1xi32>
    %84 = vector.shape_cast %81 : vector<1x1xf32> to vector<1x1xf32>
    %85 = vector.broadcast %84 : vector<1x1xf32> to vector<4x1xf32>
    %86 = arith.select %83, %85, %72 : vector<4x1xi1>, vector<4x1xf32>
    %c192_i32_41 = arith.constant 192 : i32
    %87 = vector.broadcast %c192_i32_41 : i32 to vector<256x1xi32>
    %88 = arith.cmpi sge, %42, %87 : vector<256x1xi32>
    %c256_i32 = arith.constant 256 : i32
    %89 = vector.broadcast %c256_i32 : i32 to vector<256x1xi32>
    %90 = arith.cmpi slt, %42, %89 : vector<256x1xi32>
    %91 = arith.andi %88, %90 : vector<256x1xi1>
    %cst_42 = arith.constant 0.000000e+00 : f32
    %92 = vector.broadcast %cst_42 : f32 to vector<256x1xf32>
    %93 = arith.select %91, %41, %92 : vector<256x1xi1>, vector<256x1xf32>
    %cst_43 = arith.constant dense<0.000000e+00> : vector<1xf32>
    %94 = vector.multi_reduction <add>, %93, %cst_43 [0] : vector<256x1xf32> to vector<1xf32>
    %95 = vector.shape_cast %94 : vector<1xf32> to vector<1x1xf32>
    %c3_i32 = arith.constant 3 : i32
    %96 = vector.broadcast %c3_i32 : i32 to vector<4x1xi32>
    %97 = arith.cmpi eq, %43, %96 : vector<4x1xi32>
    %98 = vector.shape_cast %95 : vector<1x1xf32> to vector<1x1xf32>
    %99 = vector.broadcast %98 : vector<1x1xf32> to vector<4x1xf32>
    %100 = arith.select %97, %99, %86 : vector<4x1xi1>, vector<4x1xf32>
    %101 = math.sqrt %100 : vector<4x1xf32>
    %c0_44 = arith.constant 0 : index
    %c0_45 = arith.constant 0 : index
    %102 = vector.load %arg11[%c0_44, %c0_45] : memref<4x1xf32, #tpu.memory_space<vmem>>, vector<4x1xf32>
    tpu.vector_store %arg11[%c0_44, %c0_45], %101 {strides = array<i32>} : memref<4x1xf32, #tpu.memory_space<vmem>>, vector<4x1xf32>,
    return
  }
}

</mosaic_0001>

<bundles_post_ra>
// kernel: gae_forward_batched.1
= control target key start
LH: loop header
LB: loop body
LE: loop exit
PB: predicated region body
PF: predicated region fallthrough
CT: control target
= control target key end

     0   :  { %vm199_vm0 = vcmask 261120   ;;  %vm1154_vm1 = vcmask 130048   ;;  %vm1617_vm2 = vcmask 64512   ;;  %vm2427_vm7 = vcmask 3072   ;;  %s3595_s3 = inlined_call_operand.vmem [shape: bf16[32,32], index: 3, kind: input, shape index: {}]   ;;  %s3596_s0 = inlined_call_operand.vmem [shape: bf16[256,32], index: 0, kind: input, shape index: {}]   ;;  %s3597_s1 = inlined_call_operand.vmem [shape: bf16[256,256], index: 1, kind: input, shape index: {}]   ;;  %s3598_s4 = inlined_call_operand.vmem [shape: f32[1,32], index: 4, kind: input, shape index: {}]   ;;  %s3599_s5 = inlined_call_operand.vmem [shape: bf16[32,16], index: 5, kind: input, shape index: {}]   ;;  %s3600_s6 = inlined_call_operand.vmem [shape: f32[1,16], index: 6, kind: input, shape index: {}]   ;;  %s3601_s7 = inlined_call_operand.vmem [shape: bf16[16,16], index: 7, kind: input, shape index: {}]   ;;  %s3602_s8 = inlined_call_operand.vmem [shape: f32[1,16], index: 8, kind: input, shape index: {}]   ;;  %s3603_s9 = inlined_call_operand.vmem [shape: bf16[16,8], index: 9, kind: input, shape index: {}]   ;;  %s3604_s10 = inlined_call_operand.vmem [shape: f32[1,8], index: 10, kind: input, shape index: {}]   ;;  %s3605_s2 = inlined_call_operand.vmem [shape: f32[256,8], index: 2, kind: input, shape index: {}]   ;;  %s3606_s11 = inlined_call_operand.vmem [shape: f32[4,1], index: 11, kind: output, shape index: {}]  }
   0x1   :  { %v2762_v0 = vld [vmem:[%s3595_s3 + $0x8] sm:$0xff]  ;;  %v2761_v1 = vld [vmem:[%s3595_s3] sm:$0xff]  ;;  %v2715_v4 = vld [vmem:[%s3596_s0 + $0x10] sm:$0xff] }
   0x2   :  { %254 = vmatpush.bf16.msra.mxu0 %v2762_v0  ;;  %v2713_v2 = vld [vmem:[%s3596_s0] sm:$0xff]  ;;  %v2714_v3 = vld [vmem:[%s3596_s0 + $0x8] sm:$0xff]  ;;  %v2716_v5 = vld [vmem:[%s3596_s0 + $0x18] sm:$0xff] }
   0x3   :  { %v2717_v6 = vld [vmem:[%s3596_s0 + $0x20] sm:$0xff]  ;;  %v2718_v7 = vld [vmem:[%s3596_s0 + $0x28] sm:$0xff]  ;;  %v2719_v8 = vld [vmem:[%s3596_s0 + $0x30] sm:$0xff] }
   0x4   :  { %v2720_v9 = vld [vmem:[%s3596_s0 + $0x38] sm:$0xff]  ;;  %v2721_v10 = vld [vmem:[%s3596_s0 + $0x40] sm:$0xff]  ;;  %v2722_v14 = vld [vmem:[%s3596_s0 + $0x48] sm:$0xff] }
   0x5   :  { %v2723_v18 = vld [vmem:[%s3596_s0 + $0x50] sm:$0xff]  ;;  %v2724_v22 = vld [vmem:[%s3596_s0 + $0x58] sm:$0xff]  ;;  %v2725_v26 = vld [vmem:[%s3596_s0 + $0x60] sm:$0xff] }
   0x6   :  { %255 = vmatpush.bf16.msra.mxu0 %v2761_v1  ;;  %v2726_v29 = vld [vmem:[%s3596_s0 + $0x68] sm:$0xff]  ;;  %v2727_v32 = vld [vmem:[%s3596_s0 + $0x70] sm:$0xff]  ;;  %v2728_v35 = vld [vmem:[%s3596_s0 + $0x78] sm:$0xff] }
   0x7   :  { %v2523_v57 = vld [vmem:[%s3597_s1] sm:$0xf]  ;;  %v2730_v58 = vld [vmem:[%s3597_s1 + $0x4] sm:$0xf0]  ;;  %v2531_v63 = vld [vmem:[%s3597_s1 + $0x10] sm:$0xf] }
   0x8   :  { %v2909_v59 = vor.u32 %v2730_v58, %v2523_v57  ;;  %v2732_v0 = vld [vmem:[%s3597_s1 + $0x14] sm:$0xf0] }
   0x9   :  { %2505 = vmatmul.msk.bf16.vlgmr.msra.gmra.mxu0 %vm199_vm0, %v2713_v2  ;;  %v2918_v2 = vor.u32 %v2732_v0, %v2531_v63  ;;  %v2748_v57 = vld [vmem:[%s3597_s1 + $0x94] sm:$0xf0]  ;;  %v2745_v63 = vld [vmem:[%s3597_s1 + $0x84] sm:$0xf]  ;;  %v2589_v0 = vld [vmem:[%s3597_s1 + $0x88] sm:$0xf0] }
  0x19   :  { %2506 = vmatmul.msk.bf16.gmra.mxu0 %vm199_vm0, %v2714_v3 }
  0x29   :  { %2507 = vmatmul.msk.bf16.gmra.mxu0 %vm199_vm0, %v2715_v4 }
  0x39   :  { %2508 = vmatmul.msk.bf16.gmra.mxu0 %vm199_vm0, %v2716_v5 }
  0x49   :  { %2509 = vmatmul.msk.bf16.gmra.mxu0 %vm199_vm0, %v2717_v6  ;;  %v2539_v6 = vld [vmem:[%s3597_s1 + $0x20] sm:$0xf] }
  0x59   :  { %2510 = vmatmul.msk.bf16.gmra.mxu0 %vm199_vm0, %v2718_v7  ;;  %v2734_v7 = vld [vmem:[%s3597_s1 + $0x24] sm:$0xf0] }
  0x69   :  { %2511 = vmatmul.msk.bf16.gmra.mxu0 %vm199_vm0, %v2719_v8 }
  0x79   :  { %2512 = vmatmul.msk.bf16.gmra.mxu0 %vm199_vm0, %v2720_v9  ;;  %v2927_v9 = vor.u32 %v2734_v7, %v2539_v6  ;;  %v3085_v6 = vor.u32 %v2745_v63, %v2589_v0  ;;  %v2613_v63 = vld [vmem:[%s3597_s1 + $0xb8] sm:$0xf0] }
  0x86   :  { %v257_v11 = vpop.f32.mrf.mxu0 }
  0x89   :  { %2513 = vmatmul.msk.bf16.gmra.mxu0 %vm199_vm0, %v2721_v10  ;;  %v2729_v10 = vld [vmem:[%s3597_s1 + $0x4] sm:$0xf] }
  0x8e   :  { %v259_v12 = vpop.f32.mrf.mxu0 }
  0x8f   :  { %v337_v13 = vpack.c.bf16 %v259_v12, %v257_v11  ;;  %v2525_v11 = vld [vmem:[%s3597_s1 + $0x8] sm:$0xf0] }
  0x96   :  { %v262_v15 = vpop.f32.mrf.mxu0 }
  0x99   :  { %2514 = vmatmul.msk.bf16.gmra.mxu0 %vm199_vm0, %v2722_v14  ;;  %v2547_v14 = vld [vmem:[%s3597_s1 + $0x30] sm:$0xf] }
  0x9e   :  { %v264_v16 = vpop.f32.mrf.mxu0 }
  0x9f   :  { %v338_v17 = vpack.c.bf16 %v264_v16, %v262_v15  ;;  %v2736_v15 = vld [vmem:[%s3597_s1 + $0x34] sm:$0xf0] }
  0xa0   :  { %v2945_v16 = vor.u32 %v2736_v15, %v2547_v14  ;;  %v2597_v14 = vld [vmem:[%s3597_s1 + $0x98] sm:$0xf0] }
  0xa6   :  { %v267_v19 = vpop.f32.mrf.mxu0 }
  0xa9   :  { %2515 = vmatmul.msk.bf16.gmra.mxu0 %vm199_vm0, %v2723_v18  ;;  %v2533_v18 = vld [vmem:[%s3597_s1 + $0x18] sm:$0xf0] }
  0xae   :  { %v269_v20 = vpop.f32.mrf.mxu0 }
  0xaf   :  { %v339_v21 = vpack.c.bf16 %v269_v20, %v267_v19  ;;  %v2555_v20 = vld [vmem:[%s3597_s1 + $0x40] sm:$0xf] }
  0xb6   :  { %v272_v23 = vpop.f32.mrf.mxu0 }
  0xb9   :  { %2516 = vmatmul.msk.bf16.gmra.mxu0 %vm199_vm0, %v2724_v22 }
  0xbe   :  { %v274_v24 = vpop.f32.mrf.mxu0 }
  0xbf   :  { %v340_v25 = vpack.c.bf16 %v274_v24, %v272_v23  ;;  %v2733_v23 = vld [vmem:[%s3597_s1 + $0x24] sm:$0xf]  ;;  %v2541_v24 = vld [vmem:[%s3597_s1 + $0x28] sm:$0xf0] }
  0xc6   :  { %v277_v27 = vpop.f32.mrf.mxu0 }
  0xc9   :  { %2517 = vmatmul.msk.bf16.gmra.mxu0 %vm199_vm0, %v2725_v26  ;;  %v2563_v26 = vld [vmem:[%s3597_s1 + $0x50] sm:$0xf] }
  0xce   :  { %v279_v28 = vpop.f32.mrf.mxu0 }
  0xcf   :  { %v341_v42 = vpack.c.bf16 %v279_v28, %v277_v27  ;;  %v2740_v27 = vld [vmem:[%s3597_s1 + $0x54] sm:$0xf0] }
  0xd0   :  { %v2981_v28 = vor.u32 %v2740_v27, %v2563_v26 }
  0xd6   :  { %v282_v30 = vpop.f32.mrf.mxu0 }
  0xd9   :  { %2518 = vmatmul.msk.bf16.gmra.mxu0 %vm199_vm0, %v2726_v29  ;;  %v2735_v29 = vld [vmem:[%s3597_s1 + $0x34] sm:$0xf] }
  0xde   :  { %v284_v31 = vpop.f32.mrf.mxu0 }
  0xdf   :  { %v342_v41 = vpack.c.bf16 %v284_v31, %v282_v30  ;;  %v2549_v30 = vld [vmem:[%s3597_s1 + $0x38] sm:$0xf0] }
  0xe0   :  { %v2989_v31 = vor.u32 %v2735_v29, %v2549_v30 }
  0xe6   :  { %v287_v33 = vpop.f32.mrf.mxu0 }
  0xe9   :  { %2519 = vmatmul.msk.bf16.gmra.mxu0 %vm199_vm0, %v2727_v32  ;;  %v2571_v32 = vld [vmem:[%s3597_s1 + $0x60] sm:$0xf] }
  0xee   :  { %v289_v34 = vpop.f32.mrf.mxu0 }
  0xef   :  { %v343_v39 = vpack.c.bf16 %v289_v34, %v287_v33  ;;  %v2742_v33 = vld [vmem:[%s3597_s1 + $0x64] sm:$0xf0] }
  0xf0   :  { %v2999_v34 = vor.u32 %v2742_v33, %v2571_v32 }
  0xf6   :  { %v292_v36 = vpop.f32.mrf.mxu0 }
  0xf9   :  { %2520 = vmatmul.msk.bf16.gmra.mxu0 %vm199_vm0, %v2728_v35  ;;  %v2737_v35 = vld [vmem:[%s3597_s1 + $0x44] sm:$0xf] }
  0xfe   :  { %v294_v37 = vpop.f32.mrf.mxu0 }
  0xff   :  { %v344_v38 = vpack.c.bf16 %v294_v37, %v292_v36  ;;  %v2557_v36 = vld [vmem:[%s3597_s1 + $0x48] sm:$0xf0] }
 0x100   :  { %v3007_v37 = vor.u32 %v2737_v35, %v2557_v36 }
 0x101   :  { %517 = vmatpush.bf16.msra.mxu1 %v344_v38  ;;  %v2579_v38 = vld [vmem:[%s3597_s1 + $0x70] sm:$0xf] }
 0x105   :  { %518 = vmatpush.bf16.msra.mxu1 %v343_v39  ;;  %v2744_v39 = vld [vmem:[%s3597_s1 + $0x74] sm:$0xf0] }
 0x106   :  { %v297_v40 = vpop.f32.mrf.mxu0 }
 0x109   :  { %519 = vmatpush.bf16.msra.mxu1 %v342_v41  ;;  %v2739_v41 = vld [vmem:[%s3597_s1 + $0x54] sm:$0xf] }
 0x10d   :  { %520 = vmatpush.bf16.msra.mxu1 %v341_v42  ;;  %v2565_v42 = vld [vmem:[%s3597_s1 + $0x58] sm:$0xf0] }
 0x10e   :  { %v299_v43 = vpop.f32.mrf.mxu0 }
 0x10f   :  { %v345_v12 = vpack.c.bf16 %v299_v43, %v297_v40  ;;  %v3017_v40 = vor.u32 %v2744_v39, %v2579_v38  ;;  %v3025_v43 = vor.u32 %v2739_v41, %v2565_v42  ;;  %v2749_v38 = vld [vmem:[%s3597_s1 + $0xa4] sm:$0xf]  ;;  %v2605_v39 = vld [vmem:[%s3597_s1 + $0xa8] sm:$0xf0]  ;;  %v2619_v42 = vld [vmem:[%s3597_s1 + $0xc0] sm:$0xf] }
 0x111   :  { %521 = vmatpush.bf16.msra.mxu1 %v340_v25  ;;  %v2971_v25 = vor.u32 %v2733_v23, %v2541_v24 }
 0x115   :  { %522 = vmatpush.bf16.msra.mxu1 %v339_v21  ;;  %v2738_v21 = vld [vmem:[%s3597_s1 + $0x44] sm:$0xf0] }
 0x116   :  { %v302_v44 = vpop.f32.mrf.mxu0  ;;  %v2963_v22 = vor.u32 %v2738_v21, %v2555_v20 }
 0x119   :  { %523 = vmatpush.bf16.msra.mxu1 %v338_v17  ;;  %v2731_v17 = vld [vmem:[%s3597_s1 + $0x14] sm:$0xf] }
 0x11a   :  { %v2953_v19 = vor.u32 %v2731_v17, %v2533_v18  ;;  %v2611_v17 = vld [vmem:[%s3597_s1 + $0xb0] sm:$0xf]  ;;  %v2752_v18 = vld [vmem:[%s3597_s1 + $0xb4] sm:$0xf0] }
 0x11b   :  { %v3108_v23 = vor.u32 %v2752_v18, %v2611_v17 }
 0x11d   :  { %524 = vmatpush.bf16.msra.mxu1 %v337_v13  ;;  %v2935_v13 = vor.u32 %v2729_v10, %v2525_v11 }
 0x11e   :  { %v304_v45 = vpop.f32.mrf.mxu0 }
 0x11f   :  { %v346_v8 = vpack.c.bf16 %v304_v45, %v302_v44  ;;  %v2587_v44 = vld [vmem:[%s3597_s1 + $0x80] sm:$0xf]  ;;  %v2746_v45 = vld [vmem:[%s3597_s1 + $0x84] sm:$0xf0] }
 0x120   :  { %525 = vmatmul.bf16.vlgmr.msra.gmra.mxu1 %v2909_v59 }
 0x126   :  { %v307_v46 = vpop.f32.mrf.mxu0 }
 0x12e   :  { %v309_v47 = vpop.f32.mrf.mxu0 }
 0x12f   :  { %v347_v5 = vpack.c.bf16 %v309_v47, %v307_v46  ;;  %v3035_v46 = vor.u32 %v2746_v45, %v2587_v44  ;;  %v2741_v47 = vld [vmem:[%s3597_s1 + $0x64] sm:$0xf]  ;;  %v2754_v44 = vld [vmem:[%s3597_s1 + $0xc4] sm:$0xf0] }
 0x130   :  { %530 = vmatmul.bf16.gmra.mxu1 %v2918_v2 }
 0x136   :  { %v312_v48 = vpop.f32.mrf.mxu0 }
 0x13e   :  { %v314_v49 = vpop.f32.mrf.mxu0 }
 0x13f   :  { %v348_v4 = vpack.c.bf16 %v314_v49, %v312_v48  ;;  %v2573_v48 = vld [vmem:[%s3597_s1 + $0x68] sm:$0xf0] }
 0x140   :  { %535 = vmatmul.bf16.gmra.mxu1 %v2927_v9 }
 0x146   :  { %v317_v50 = vpop.f32.mrf.mxu0 }
 0x14e   :  { %v319_v51 = vpop.f32.mrf.mxu0 }
 0x14f   :  { %v349_v3 = vpack.c.bf16 %v319_v51, %v317_v50  ;;  %v3043_v50 = vor.u32 %v2741_v47, %v2573_v48  ;;  %v3129_v48 = vor.u32 %v2754_v44, %v2619_v42 }
 0x150   :  { %540 = vmatmul.bf16.gmra.mxu1 %v2945_v16 }
 0x156   :  { %v322_v52 = vpop.f32.mrf.mxu0 }
 0x15e   :  { %v324_v53 = vpop.f32.mrf.mxu0 }
 0x15f   :  { %v350_v1 = vpack.c.bf16 %v324_v53, %v322_v52  ;;  %v2743_v52 = vld [vmem:[%s3597_s1 + $0x74] sm:$0xf]  ;;  %v2581_v53 = vld [vmem:[%s3597_s1 + $0x78] sm:$0xf0] }
 0x160   :  { %545 = vmatmul.bf16.gmra.mxu1 %v2963_v22 }
 0x166   :  { %v327_v54 = vpop.f32.mrf.mxu0 }
 0x16e   :  { %v329_v55 = vpop.f32.mrf.mxu0 }
 0x16f   :  { %v351_v62 = vpack.c.bf16 %v329_v55, %v327_v54  ;;  %v2764_v55 = vld [vmem:[%s3599_s5 + $0x8] sm:$0xff] }
 0x170   :  { %550 = vmatmul.bf16.gmra.mxu1 %v2981_v28  ;;  %813 = vmatpush.bf16.msra.mxu3 %v2764_v55 }
 0x176   :  { %v332_v56 = vpop.f32.mrf.mxu0 }
 0x17e   :  { %v334_v60 = vpop.f32.mrf.mxu0 }
 0x17f   :  { %v352_v61 = vpack.c.bf16 %v334_v60, %v332_v56  ;;  %v2595_v56 = vld [vmem:[%s3597_s1 + $0x90] sm:$0xf]  ;;  %v3064_v60 = vor.u32 %v2743_v52, %v2581_v53  ;;  %v3131_v52 = vor.u32 %v2749_v38, %v2605_v39 }
 0x180   :  { %555 = vmatmul.bf16.gmra.mxu1 %v2999_v34  ;;  %v3062_v58 = vor.u32 %v2748_v57, %v2595_v56 }
 0x181   :  { %606 = vmatpush.bf16.msra.mxu2 %v352_v61  ;;  %v2763_v61 = vld [vmem:[%s3599_s5] sm:$0xff] }
 0x182   :  { %814 = vmatpush.bf16.msra.mxu3 %v2763_v61 }
 0x185   :  { %607 = vmatpush.bf16.msra.mxu2 %v351_v62 }
 0x189   :  { %608 = vmatpush.bf16.msra.mxu2 %v350_v1 }
 0x18d   :  { %609 = vmatpush.bf16.msra.mxu2 %v349_v3  ;;  %v2603_v3 = vld [vmem:[%s3597_s1 + $0xa0] sm:$0xf] }
 0x190   :  { %560 = vmatmul.bf16.gmra.mxu1 %v3017_v40 }
 0x191   :  { %610 = vmatpush.bf16.msra.mxu2 %v348_v4  ;;  %v2750_v4 = vld [vmem:[%s3597_s1 + $0xa4] sm:$0xf0] }
 0x195   :  { %611 = vmatpush.bf16.msra.mxu2 %v347_v5  ;;  %v3083_v5 = vor.u32 %v2750_v4, %v2603_v3  ;;  %v2627_v3 = vld [vmem:[%s3597_s1 + $0xd0] sm:$0xf]  ;;  %v2756_v4 = vld [vmem:[%s3597_s1 + $0xd4] sm:$0xf0] }
 0x199   :  { %612 = vmatpush.bf16.msra.mxu2 %v346_v8  ;;  %v3092_v8 = vld [vmem:[%s3598_s4] ss:$0 sm:$0xff] }
 0x19d   :  { %613 = vmatpush.bf16.msra.mxu2 %v345_v12  ;;  %v526_v49 = vpop.f32.mrf.mxu1  ;;  %v2747_v12 = vld [vmem:[%s3597_s1 + $0x94] sm:$0xf] }
 0x19e   :  { %v527_v11 = vadd.f32 %v3092_v8, %v526_v49  ;;  %v3110_v27 = vor.u32 %v2747_v12, %v2597_v14 }
 0x1a0   :  { %614 = vmatmul.bf16.vlgmr.msra.gmra.mxu2 %v2935_v13  ;;  %565 = vmatmul.bf16.gmra.mxu1 %v3035_v46 }
 0x1a5   :  { %v528_v51 = vpop.f32.mrf.mxu1 }
 0x1a6   :  { %v529_v20 = vadd.f32 %v3092_v8, %v528_v51 }
 0x1ad   :  { %v531_v54 = vpop.f32.mrf.mxu1 }
 0x1ae   :  { %v532_v36 = vadd.f32 %v3092_v8, %v531_v54 }
 0x1b0   :  { %619 = vmatmul.bf16.gmra.mxu2 %v2953_v19  ;;  %570 = vmatmul.bf16.gmra.mxu1 %v3062_v58 }
 0x1b5   :  { %v533_v62 = vpop.f32.mrf.mxu1 }
 0x1b6   :  { %v534_v45 = vadd.f32 %v3092_v8, %v533_v62  ;;  %v2751_v62 = vld [vmem:[%s3597_s1 + $0xb4] sm:$0xf] }
 0x1b7   :  { %v3152_v17 = vor.u32 %v2751_v62, %v2613_v63  ;;  %v2760_v62 = vld [vmem:[%s3597_s1 + $0xf4] sm:$0xf0] }
 0x1bd   :  { %v536_v1 = vpop.f32.mrf.mxu1 }
 0x1be   :  { %v537_v61 = vadd.f32 %v3092_v8, %v536_v1 }
 0x1c0   :  { %624 = vmatmul.bf16.gmra.mxu2 %v2971_v25  ;;  %575 = vmatmul.bf16.gmra.mxu1 %v3083_v5 }
 0x1c5   :  { %v538_v7 = vpop.f32.mrf.mxu1 }
 0x1cd   :  { %v541_v15 = vpop.f32.mrf.mxu1 }
 0x1d0   :  { %629 = vmatmul.bf16.gmra.mxu2 %v2989_v31  ;;  %580 = vmatmul.bf16.gmra.mxu1 %v3108_v23 }
 0x1d5   :  { %v543_v33 = vpop.f32.mrf.mxu1 }
 0x1d6   :  { %v544_v38 = vadd.f32 %v3092_v8, %v543_v33 }
 0x1dd   :  { %v546_v41 = vpop.f32.mrf.mxu1 }
 0x1de   :  { %v547_v33 = vadd.f32 %v3092_v8, %v546_v41 }
 0x1e0   :  { %634 = vmatmul.bf16.gmra.mxu2 %v3007_v37  ;;  %585 = vmatmul.bf16.gmra.mxu1 %v3129_v48 }
 0x1e5   :  { %v548_v56 = vpop.f32.mrf.mxu1 }
 0x1e6   :  { %v549_v63 = vadd.f32 %v3092_v8, %v548_v56 }
 0x1ed   :  { %v551_v0 = vpop.f32.mrf.mxu1 }
 0x1ee   :  { %v552_v56 = vadd.f32 %v3092_v8, %v551_v0 }
 0x1f0   :  { %639 = vmatmul.bf16.gmra.mxu2 %v3025_v43 }
 0x200   :  { %644 = vmatmul.bf16.gmra.mxu2 %v3043_v50 }
 0x210   :  { %649 = vmatmul.bf16.gmra.mxu2 %v3064_v60 }
 0x220   :  { %654 = vmatmul.bf16.gmra.mxu2 %v3085_v6 }
 0x223   :  { %v615_v10 = vpop.f32.mrf.mxu2 }
 0x224   :  { %v616_v21 = vadd.f32 %v615_v10, %v527_v11  ;;  %v539_v10 = vadd.f32 %v3092_v8, %v538_v7  ;;  %v3150_v11 = vor.u32 %v2756_v4, %v2627_v3  ;;  %v542_v7 = vadd.f32 %v3092_v8, %v541_v15 }
 0x226   :  { %v695_v29 = vmax.f32 %v616_v21, 0.0  ;;  %590 = vmatmul.bf16.gmra.mxu1 %v3150_v11 }
 0x22b   :  { %v617_v24 = vpop.f32.mrf.mxu2 }
 0x22c   :  { %v618_v26 = vadd.f32 %v617_v24, %v529_v20  ;;  %v553_v24 = vpop.f32.mrf.mxu1 }
 0x22e   :  { %v696_v30 = vmax.f32 %v618_v26, 0.0 }
 0x230   :  { %659 = vmatmul.bf16.gmra.mxu2 %v3110_v27  ;;  %v727_v32 = vpack.c.bf16 %v696_v30, %v695_v29  ;;  %v2753_v29 = vld [vmem:[%s3597_s1 + $0xc4] sm:$0xf]  ;;  %v2621_v30 = vld [vmem:[%s3597_s1 + $0xc8] sm:$0xf0] }
 0x232   :  { %2657 = vmatmul.msk.bf16.vlgmr.msra.gmra.mxu3 %vm199_vm0, %v727_v32 }
 0x233   :  { %v620_v35 = vpop.f32.mrf.mxu2 }
 0x234   :  { %v621_v47 = vadd.f32 %v620_v35, %v532_v36  ;;  %v556_v32 = vpop.f32.mrf.mxu1  ;;  %v2635_v35 = vld [vmem:[%s3597_s1 + $0xe0] sm:$0xf]  ;;  %v2758_v36 = vld [vmem:[%s3597_s1 + $0xe4] sm:$0xf0] }
 0x235   :  { %v3171_v39 = vor.u32 %v2758_v36, %v2635_v35 }
 0x236   :  { %v697_v53 = vmax.f32 %v621_v47, 0.0 }
 0x237   :  { %595 = vmatmul.bf16.gmra.mxu1 %v3171_v39 }
 0x23b   :  { %v622_v49 = vpop.f32.mrf.mxu2 }
 0x23c   :  { %v623_v51 = vadd.f32 %v622_v49, %v534_v45  ;;  %v3173_v45 = vor.u32 %v2753_v29, %v2621_v30  ;;  %v2637_v29 = vld [vmem:[%s3597_s1 + $0xe8] sm:$0xf0]  ;;  %v554_v30 = vadd.f32 %v3092_v8, %v553_v24  ;;  %v2759_v24 = vld [vmem:[%s3597_s1 + $0xf4] sm:$0xf] }
 0x23e   :  { %v698_v54 = vmax.f32 %v623_v51, 0.0 }
 0x240   :  { %664 = vmatmul.bf16.gmra.mxu2 %v3131_v52  ;;  %v728_v55 = vpack.c.bf16 %v698_v54, %v697_v53  ;;  %v558_v54 = vpop.f32.mrf.mxu1 }
 0x242   :  { %2658 = vmatmul.msk.bf16.gmra.mxu3 %vm199_vm0, %v728_v55  ;;  %v2755_v55 = vld [vmem:[%s3597_s1 + $0xd4] sm:$0xf] }
 0x243   :  { %v625_v57 = vpop.f32.mrf.mxu2 }
 0x244   :  { %v626_v1 = vadd.f32 %v625_v57, %v537_v61  ;;  %v2629_v57 = vld [vmem:[%s3597_s1 + $0xd8] sm:$0xf0]  ;;  %v2643_v61 = vld [vmem:[%s3597_s1 + $0xf0] sm:$0xf] }
 0x245   :  { %v3192_v41 = vor.u32 %v2760_v62, %v2643_v61 }
 0x246   :  { %v699_v18 = vmax.f32 %v626_v1, 0.0  ;;  %v3194_v1 = vor.u32 %v2755_v55, %v2629_v57 }
 0x247   :  { %600 = vmatmul.bf16.gmra.mxu1 %v3192_v41 }
 0x24b   :  { %v627_v12 = vpop.f32.mrf.mxu2 }
 0x24c   :  { %v628_v14 = vadd.f32 %v627_v12, %v539_v10  ;;  %v561_v12 = vpop.f32.mrf.mxu1 }
 0x24e   :  { %v700_v20 = vmax.f32 %v628_v14, 0.0 }
 0x250   :  { %669 = vmatmul.bf16.gmra.mxu2 %v3152_v17  ;;  %v729_v21 = vpack.c.bf16 %v700_v20, %v699_v18 }
 0x252   :  { %2659 = vmatmul.msk.bf16.gmra.mxu3 %vm199_vm0, %v729_v21 }
 0x253   :  { %v630_v26 = vpop.f32.mrf.mxu2 }
 0x254   :  { %v631_v15 = vadd.f32 %v630_v26, %v542_v7  ;;  %v563_v26 = vpop.f32.mrf.mxu1  ;;  %v2757_v7 = vld [vmem:[%s3597_s1 + $0xe4] sm:$0xf] }
 0x256   :  { %v701_v47 = vmax.f32 %v631_v15, 0.0  ;;  %v3207_v15 = vor.u32 %v2757_v7, %v2637_v29 }
 0x25b   :  { %v632_v42 = vpop.f32.mrf.mxu2 }
 0x25c   :  { %v633_v44 = vadd.f32 %v632_v42, %v544_v38 }
 0x25e   :  { %v702_v49 = vmax.f32 %v633_v44, 0.0 }
 0x260   :  { %674 = vmatmul.bf16.gmra.mxu2 %v3173_v45  ;;  %v730_v51 = vpack.c.bf16 %v702_v49, %v701_v47  ;;  %v566_v47 = vpop.f32.mrf.mxu1 }
 0x262   :  { %2660 = vmatmul.msk.bf16.gmra.mxu3 %vm199_vm0, %v730_v51  ;;  %v557_v51 = vadd.f32 %v3092_v8, %v556_v32 }
 0x263   :  { %v635_v53 = vpop.f32.mrf.mxu2 }
 0x264   :  { %v636_v3 = vadd.f32 %v635_v53, %v547_v33  ;;  %v2645_v53 = vld [vmem:[%s3597_s1 + $0xf8] sm:$0xf0]  ;;  %v559_v33 = vadd.f32 %v3092_v8, %v558_v54 }
 0x266   :  { %v703_v14 = vmax.f32 %v636_v3, 0.0 }
 0x268   :  { %v568_v61 = vpop.f32.mrf.mxu1 }
 0x26b   :  { %v637_v4 = vpop.f32.mrf.mxu2 }
 0x26c   :  { %v638_v10 = vadd.f32 %v637_v4, %v549_v63  ;;  %v3219_v63 = vor.u32 %v2759_v24, %v2645_v53 }
 0x26e   :  { %v704_v18 = vmax.f32 %v638_v10, 0.0 }
 0x270   :  { %679 = vmatmul.bf16.gmra.mxu2 %v3194_v1  ;;  %v731_v20 = vpack.c.bf16 %v704_v18, %v703_v14  ;;  %v571_v14 = vpop.f32.mrf.mxu1  ;;  %v562_v18 = vadd.f32 %v3092_v8, %v561_v12 }
 0x272   :  { %2661 = vmatmul.msk.bf16.gmra.mxu3 %vm199_vm0, %v731_v20  ;;  %v564_v20 = vadd.f32 %v3092_v8, %v563_v26 }
 0x273   :  { %v640_v21 = vpop.f32.mrf.mxu2 }
 0x274   :  { %v641_v35 = vadd.f32 %v640_v21, %v552_v56 }
 0x276   :  { %v705_v42 = vmax.f32 %v641_v35, 0.0 }
 0x27b   :  { %v642_v36 = vpop.f32.mrf.mxu2 }
 0x27c   :  { %v643_v38 = vadd.f32 %v642_v36, %v554_v30  ;;  %v573_v30 = vpop.f32.mrf.mxu1 }
 0x27e   :  { %v706_v44 = vmax.f32 %v643_v38, 0.0  ;;  %v567_v38 = vadd.f32 %v3092_v8, %v566_v47 }
 0x280   :  { %684 = vmatmul.bf16.gmra.mxu2 %v3207_v15  ;;  %v732_v0 = vpack.c.bf16 %v706_v44, %v705_v42  ;;  %v569_v44 = vadd.f32 %v3092_v8, %v568_v61 }
 0x282   :  { %2662 = vmatmul.msk.bf16.gmra.mxu3 %vm199_vm0, %v732_v0 }
 0x283   :  { %v645_v49 = vpop.f32.mrf.mxu2 }
 0x284   :  { %v646_v55 = vadd.f32 %v645_v49, %v557_v51  ;;  %v576_v42 = vpop.f32.mrf.mxu1 }
 0x286   :  { %v707_v3 = vmax.f32 %v646_v55, 0.0 }
 0x28b   :  { %v647_v57 = vpop.f32.mrf.mxu2 }
 0x28c   :  { %v648_v62 = vadd.f32 %v647_v57, %v559_v33  ;;  %v578_v33 = vpop.f32.mrf.mxu1  ;;  %v572_v57 = vadd.f32 %v3092_v8, %v571_v14  ;;  %v577_v14 = vadd.f32 %v3092_v8, %v576_v42 }
 0x28e   :  { %v708_v4 = vmax.f32 %v648_v62, 0.0  ;;  %v574_v62 = vadd.f32 %v3092_v8, %v573_v30 }
 0x290   :  { %689 = vmatmul.bf16.gmra.mxu2 %v3219_v63  ;;  %v733_v32 = vpack.c.bf16 %v708_v4, %v707_v3 }
 0x292   :  { %2663 = vmatmul.msk.bf16.gmra.mxu3 %vm199_vm0, %v733_v32 }
 0x293   :  { %v650_v10 = vpop.f32.mrf.mxu2 }
 0x294   :  { %v651_v54 = vadd.f32 %v650_v10, %v562_v18  ;;  %v581_v32 = vpop.f32.mrf.mxu1 }
 0x295   :  { %v582_v42 = vadd.f32 %v3092_v8, %v581_v32 }
 0x296   :  { %v709_v7 = vmax.f32 %v651_v54, 0.0 }
 0x29b   :  { %v652_v21 = vpop.f32.mrf.mxu2 }
 0x29c   :  { %v653_v56 = vadd.f32 %v652_v21, %v564_v20 }
 0x29e   :  { %v710_v29 = vmax.f32 %v653_v56, 0.0 }
 0x2a0   :  { %v734_v35 = vpack.c.bf16 %v710_v29, %v709_v7  ;;  %v583_v7 = vpop.f32.mrf.mxu1  ;;  %v579_v29 = vadd.f32 %v3092_v8, %v578_v33 }
 0x2a2   :  { %2664 = vmatmul.msk.bf16.gmra.mxu3 %vm199_vm0, %v734_v35 }
 0x2a3   :  { %v655_v36 = vpop.f32.mrf.mxu2 }
 0x2a4   :  { %v656_v0 = vadd.f32 %v655_v36, %v567_v38 }
 0x2a6   :  { %v711_v51 = vmax.f32 %v656_v0, 0.0 }
 0x2ab   :  { %v657_v49 = vpop.f32.mrf.mxu2 }
 0x2ac   :  { %v658_v12 = vadd.f32 %v657_v49, %v569_v44 }
 0x2ae   :  { %v712_v26 = vmax.f32 %v658_v12, 0.0 }
 0x2b0   :  { %v735_v24 = vpack.c.bf16 %v712_v26, %v711_v51  ;;  %v586_v51 = vpop.f32.mrf.mxu1 }
 0x2b2   :  { %2665 = vmatmul.msk.bf16.gmra.mxu3 %vm199_vm0, %v735_v24 }
 0x2b3   :  { %v660_v53 = vpop.f32.mrf.mxu2 }
 0x2b4   :  { %v661_v47 = vadd.f32 %v660_v53, %v572_v57  ;;  %v584_v53 = vadd.f32 %v3092_v8, %v583_v7  ;;  %v587_v7 = vadd.f32 %v3092_v8, %v586_v51 }
 0x2b5   :  { %v3229_v55 = vpop.f32.mrf.mxu3 }
 0x2b6   :  { %v713_v10 = vmax.f32 %v661_v47, 0.0 }
 0x2bb   :  { %v662_v3 = vpop.f32.mrf.mxu2 }
 0x2bc   :  { %v663_v4 = vadd.f32 %v662_v3, %v574_v62  ;;  %v588_v62 = vpop.f32.mrf.mxu1 }
 0x2bd   :  { %v3233_v61 = vpop.f32.mrf.mxu3 }
 0x2be   :  { %v714_v18 = vmax.f32 %v663_v4, 0.0 }
 0x2c0   :  { %v736_v54 = vpack.c.bf16 %v714_v18, %v713_v10 }
 0x2c2   :  { %2666 = vmatmul.msk.bf16.gmra.mxu3 %vm199_vm0, %v736_v54 }
 0x2c3   :  { %v665_v21 = vpop.f32.mrf.mxu2 }
 0x2c4   :  { %v666_v30 = vadd.f32 %v665_v21, %v577_v14  ;;  %v591_v32 = vpop.f32.mrf.mxu1 }
 0x2c5   :  { %v3238_v56 = vpop.f32.mrf.mxu3 }
 0x2c6   :  { %v715_v44 = vmax.f32 %v666_v30, 0.0 }
 0x2cb   :  { %v667_v35 = vpop.f32.mrf.mxu2 }
 0x2cc   :  { %v668_v36 = vadd.f32 %v667_v35, %v579_v29  ;;  %v589_v29 = vadd.f32 %v3092_v8, %v588_v62 }
 0x2cd   :  { %v3242_v38 = vpop.f32.mrf.mxu3 }
 0x2ce   :  { %v716_v0 = vmax.f32 %v668_v36, 0.0 }
 0x2d0   :  { %v737_v12 = vpack.c.bf16 %v716_v0, %v715_v44 }
 0x2d2   :  { %2667 = vmatmul.msk.bf16.gmra.mxu3 %vm199_vm0, %v737_v12 }
 0x2d3   :  { %v670_v26 = vpop.f32.mrf.mxu2 }
 0x2d4   :  { %v671_v33 = vadd.f32 %v670_v26, %v582_v42  ;;  %v593_v42 = vpop.f32.mrf.mxu1 }
 0x2d5   :  { %v3247_v24 = vpop.f32.mrf.mxu3  ;;  %v594_v51 = vadd.f32 %v3092_v8, %v593_v42 }
 0x2d6   :  { %v717_v4 = vmax.f32 %v671_v33, 0.0 }
 0x2db   :  { %v672_v57 = vpop.f32.mrf.mxu2 }
 0x2dc   :  { %v673_v47 = vadd.f32 %v672_v57, %v584_v53 }
 0x2dd   :  { %v3251_v3 = vpop.f32.mrf.mxu3 }
 0x2de   :  { %v718_v10 = vmax.f32 %v673_v47, 0.0  ;;  %v898_v18 = vpack.c.bf16 %v3251_v3, %v3247_v24  ;;  %v592_v47 = vadd.f32 %v3092_v8, %v591_v32 }
 0x2e0   :  { %v738_v54 = vpack.c.bf16 %v718_v10, %v717_v4  ;;  %v596_v4 = vpop.f32.mrf.mxu1 }
 0x2e2   :  { %2668 = vmatmul.msk.bf16.gmra.mxu3 %vm199_vm0, %v738_v54 }
 0x2e3   :  { %v675_v21 = vpop.f32.mrf.mxu2 }
 0x2e4   :  { %v676_v30 = vadd.f32 %v675_v21, %v587_v7 }
 0x2e5   :  { %v3256_v14 = vpop.f32.mrf.mxu3 }
 0x2e6   :  { %v719_v0 = vmax.f32 %v676_v30, 0.0 }
 0x2eb   :  { %v677_v35 = vpop.f32.mrf.mxu2 }
 0x2ec   :  { %v678_v36 = vadd.f32 %v677_v35, %v589_v29 }
 0x2ed   :  { %v833_v44 = vpop.f32.mrf.mxu3 }
 0x2ee   :  { %v720_v12 = vmax.f32 %v678_v36, 0.0  ;;  %v899_v26 = vpack.c.bf16 %v833_v44, %v3256_v14  ;;  %v598_v14 = vpop.f32.mrf.mxu1  ;;  %v597_v44 = vadd.f32 %v3092_v8, %v596_v4 }
 0x2f0   :  { %v739_v53 = vpack.c.bf16 %v720_v12, %v719_v0  ;;  %v599_v0 = vadd.f32 %v3092_v8, %v598_v14 }
 0x2f2   :  { %2669 = vmatmul.msk.bf16.gmra.mxu3 %vm199_vm0, %v739_v53 }
 0x2f3   :  { %v680_v33 = vpop.f32.mrf.mxu2 }
 0x2f4   :  { %v681_v62 = vadd.f32 %v680_v33, %v592_v47 }
 0x2f5   :  { %v836_v57 = vpop.f32.mrf.mxu3 }
 0x2f6   :  { %v721_v7 = vmax.f32 %v681_v62, 0.0  ;;  %v601_v42 = vpop.f32.mrf.mxu1 }
 0x2fb   :  { %v682_v10 = vpop.f32.mrf.mxu2 }
 0x2fc   :  { %v683_v54 = vadd.f32 %v682_v10, %v594_v51 }
 0x2fd   :  { %v838_v21 = vpop.f32.mrf.mxu3 }
 0x2fe   :  { %v722_v29 = vmax.f32 %v683_v54, 0.0  ;;  %v900_v49 = vpack.c.bf16 %v838_v21, %v836_v57 }
 0x300   :  { %v740_v30 = vpack.c.bf16 %v722_v29, %v721_v7  ;;  %v602_v7 = vadd.f32 %v3092_v8, %v601_v42  ;;  %v603_v29 = vpop.f32.mrf.mxu1 }
 0x302   :  { %2670 = vmatmul.msk.bf16.gmra.mxu3 %vm199_vm0, %v740_v30  ;;  %v604_v30 = vadd.f32 %v3092_v8, %v603_v29 }
 0x303   :  { %v685_v35 = vpop.f32.mrf.mxu2 }
 0x304   :  { %v686_v32 = vadd.f32 %v685_v35, %v597_v44 }
 0x305   :  { %v841_v36 = vpop.f32.mrf.mxu3 }
 0x306   :  { %v723_v47 = vmax.f32 %v686_v32, 0.0 }
 0x30b   :  { %v687_v12 = vpop.f32.mrf.mxu2 }
 0x30c   :  { %v688_v53 = vadd.f32 %v687_v12, %v599_v0 }
 0x30d   :  { %v843_v33 = vpop.f32.mrf.mxu3 }
 0x30e   :  { %v724_v51 = vmax.f32 %v688_v53, 0.0  ;;  %v901_v42 = vpack.c.bf16 %v843_v33, %v841_v36 }
 0x310   :  { %v741_v10 = vpack.c.bf16 %v724_v51, %v723_v47 }
 0x312   :  { %2671 = vmatmul.msk.bf16.gmra.mxu3 %vm199_vm0, %v741_v10 }
 0x313   :  { %v690_v62 = vpop.f32.mrf.mxu2 }
 0x314   :  { %v691_v4 = vadd.f32 %v690_v62, %v602_v7  ;;  %v3607_v62 = vpack.c.bf16 %v3242_v38, %v3238_v56 }
 0x315   :  { %v846_v54 = vpop.f32.mrf.mxu3 }
 0x316   :  { %v725_v44 = vmax.f32 %v691_v4, 0.0 }
 0x31b   :  { %v692_v20 = vpop.f32.mrf.mxu2 }
 0x31c   :  { %v693_v14 = vadd.f32 %v692_v20, %v604_v30 }
 0x31d   :  { %v848_v35 = vpop.f32.mrf.mxu3 }
 0x31e   :  { %v726_v0 = vmax.f32 %v693_v14, 0.0  ;;  %v902_v51 = vpack.c.bf16 %v848_v35, %v846_v54  ;;  %v3608_v54 = vpack.c.bf16 %v3233_v61, %v3229_v55 }
 0x320   :  { %v742_v12 = vpack.c.bf16 %v726_v0, %v725_v44 }
 0x322   :  { %2672 = vmatmul.msk.bf16.gmra.mxu3 %vm199_vm0, %v742_v12 }
 0x325   :  { %v851_v32 = vpop.f32.mrf.mxu3 }
 0x32d   :  { %v853_v53 = vpop.f32.mrf.mxu3 }
 0x32e   :  { %v903_v47 = vpack.c.bf16 %v853_v53, %v851_v32 }
 0x330   :  { %916 = vmatpush.bf16.msrb.mxu0 %v903_v47 }
 0x334   :  { %917 = vmatpush.bf16.msrb.mxu0 %v902_v51 }
 0x335   :  { %v856_v10 = vpop.f32.mrf.mxu3 }
 0x338   :  { %918 = vmatpush.bf16.msrb.mxu0 %v901_v42 }
 0x33c   :  { %919 = vmatpush.bf16.msrb.mxu0 %v900_v49 }
 0x33d   :  { %v858_v8 = vpop.f32.mrf.mxu3 }
 0x340   :  { %920 = vmatpush.bf16.msrb.mxu0 %v899_v26 }
 0x344   :  { %921 = vmatpush.bf16.msrb.mxu0 %v898_v18 }
 0x345   :  { %v861_v20 = vpop.f32.mrf.mxu3 }
 0x348   :  { %922 = vmatpush.bf16.msrb.mxu0 %v3607_v62 }
 0x34c   :  { %923 = vmatpush.bf16.msrb.mxu0 %v3608_v54 }
 0x34d   :  { %v863_v7 = vpop.f32.mrf.mxu3 }
 0x34e   :  { %v905_v29 = vpack.c.bf16 %v863_v7, %v861_v20 }
 0x34f   :  { %924 = vmatmul.bf16.vlgmr.msrb.gmra.mxu0 %v2909_v59 }
 0x355   :  { %v866_v57 = vpop.f32.mrf.mxu3 }
 0x35d   :  { %v868_v49 = vpop.f32.mrf.mxu3 }
 0x35f   :  { %929 = vmatmul.bf16.gmra.mxu0 %v2918_v2 }
 0x365   :  { %v871_v26 = vpop.f32.mrf.mxu3 }
 0x36d   :  { %v873_v21 = vpop.f32.mrf.mxu3 }
 0x36f   :  { %934 = vmatmul.bf16.gmra.mxu0 %v2927_v9 }
 0x375   :  { %v876_v24 = vpop.f32.mrf.mxu3 }
 0x37d   :  { %v878_v3 = vpop.f32.mrf.mxu3 }
 0x37e   :  { %v908_v33 = vpack.c.bf16 %v878_v3, %v876_v24 }
 0x37f   :  { %939 = vmatmul.bf16.gmra.mxu0 %v2945_v16  ;;  %v907_v16 = vpack.c.bf16 %v873_v21, %v871_v26 }
 0x385   :  { %v881_v56 = vpop.f32.mrf.mxu3 }
 0x38d   :  { %v883_v38 = vpop.f32.mrf.mxu3 }
 0x38e   :  { %v909_v9 = vpack.c.bf16 %v883_v38, %v881_v56 }
 0x38f   :  { %944 = vmatmul.bf16.gmra.mxu0 %v2963_v22  ;;  %v906_v22 = vpack.c.bf16 %v868_v49, %v866_v57 }
 0x395   :  { %v886_v55 = vpop.f32.mrf.mxu3 }
 0x39d   :  { %v888_v61 = vpop.f32.mrf.mxu3 }
 0x39e   :  { %v910_v2 = vpack.c.bf16 %v888_v61, %v886_v55 }
 0x39f   :  { %949 = vmatmul.bf16.gmra.mxu0 %v2981_v28  ;;  %v904_v28 = vpack.c.bf16 %v858_v8, %v856_v10 }
 0x3a5   :  { %v891_v59 = vpop.f32.mrf.mxu3 }
 0x3ad   :  { %v893_v18 = vpop.f32.mrf.mxu3 }
 0x3ae   :  { %v911_v36 = vpack.c.bf16 %v893_v18, %v891_v59 }
 0x3af   :  { %954 = vmatmul.bf16.gmra.mxu0 %v2999_v34 }
 0x3b0   :  { %1005 = vmatpush.bf16.msrb.mxu3 %v911_v36 }
 0x3b4   :  { %1006 = vmatpush.bf16.msrb.mxu3 %v910_v2 }
 0x3b8   :  { %1007 = vmatpush.bf16.msrb.mxu3 %v909_v9 }
 0x3bc   :  { %1008 = vmatpush.bf16.msrb.mxu3 %v908_v33 }
 0x3bf   :  { %959 = vmatmul.bf16.gmra.mxu0 %v3017_v40 }
 0x3c0   :  { %1009 = vmatpush.bf16.msrb.mxu3 %v907_v16 }
 0x3c4   :  { %1010 = vmatpush.bf16.msrb.mxu3 %v906_v22 }
 0x3c8   :  { %1011 = vmatpush.bf16.msrb.mxu3 %v905_v29 }
 0x3cc   :  { %1012 = vmatpush.bf16.msrb.mxu3 %v904_v28 }
 0x3cf   :  { %1013 = vmatmul.bf16.vlgmr.msrb.gmra.mxu3 %v2935_v13  ;;  %964 = vmatmul.bf16.gmra.mxu0 %v3035_v46  ;;  %v2765_v13 = vld [vmem:[%s3601_s7] sm:$0xff] }
 0x3d0   :  { %1210 = vmatpush.bf16.msrb.mxu1 %v2765_v13 }
 0x3df   :  { %1018 = vmatmul.bf16.gmra.mxu3 %v2953_v19  ;;  %969 = vmatmul.bf16.gmra.mxu0 %v3062_v58  ;;  %v925_v19 = vpop.f32.mrf.mxu0 }
 0x3e7   :  { %v927_v34 = vpop.f32.mrf.mxu0 }
 0x3ef   :  { %1023 = vmatmul.bf16.gmra.mxu3 %v2971_v25  ;;  %974 = vmatmul.bf16.gmra.mxu0 %v3083_v5  ;;  %v930_v25 = vpop.f32.mrf.mxu0 }
 0x3ff   :  { %1028 = vmatmul.bf16.gmra.mxu3 %v2989_v31  ;;  %979 = vmatmul.bf16.gmra.mxu0 %v3108_v23  ;;  %v932_v31 = vpop.f32.mrf.mxu0 }
 0x40f   :  { %1033 = vmatmul.bf16.gmra.mxu3 %v3007_v37  ;;  %984 = vmatmul.bf16.gmra.mxu0 %v3129_v48  ;;  %v935_v37 = vpop.f32.mrf.mxu0 }
 0x417   :  { %v937_v40 = vpop.f32.mrf.mxu0 }
 0x41f   :  { %1038 = vmatmul.bf16.gmra.mxu3 %v3025_v43  ;;  %989 = vmatmul.bf16.gmra.mxu0 %v3150_v11  ;;  %v3310_v43 = vld [vmem:[%s3600_s6] ss:$0 sm:$0xff]  ;;  %v940_v58 = vpop.f32.mrf.mxu0 }
 0x420   :  { %v931_v14 = vadd.f32 %v3310_v43, %v930_v25  ;;  %v933_v0 = vadd.f32 %v3310_v43, %v932_v31  ;;  %v936_v10 = vadd.f32 %v3310_v43, %v935_v37  ;;  %v938_v20 = vadd.f32 %v3310_v43, %v937_v40 }
 0x421   :  { %v941_v21 = vadd.f32 %v3310_v43, %v940_v58 }
 0x42f   :  { %1043 = vmatmul.bf16.gmra.mxu3 %v3043_v50  ;;  %994 = vmatmul.bf16.gmra.mxu0 %v3171_v39  ;;  %v926_v50 = vadd.f32 %v3310_v43, %v925_v19  ;;  %v942_v39 = vpop.f32.mrf.mxu0 }
 0x430   :  { %v943_v56 = vadd.f32 %v3310_v43, %v942_v39 }
 0x437   :  { %v945_v35 = vpop.f32.mrf.mxu0 }
 0x438   :  { %v946_v2 = vadd.f32 %v3310_v43, %v945_v35 }
 0x43f   :  { %1048 = vmatmul.bf16.gmra.mxu3 %v3064_v60  ;;  %v928_v60 = vadd.f32 %v3310_v43, %v927_v34  ;;  %999 = vmatmul.bf16.gmra.mxu0 %v3192_v41 }
 0x44f   :  { %1053 = vmatmul.bf16.gmra.mxu3 %v3085_v6 }
 0x452   :  { %v1014_v46 = vpop.f32.mrf.mxu3 }
 0x453   :  { %v1015_v5 = vadd.f32 %v1014_v46, %v926_v50 }
 0x455   :  { %v1094_v11 = vmax.f32 %v1015_v5, 0.0 }
 0x45a   :  { %v1016_v23 = vpop.f32.mrf.mxu3 }
 0x45b   :  { %v1017_v48 = vadd.f32 %v1016_v23, %v928_v60 }
 0x45d   :  { %v1095_v30 = vmax.f32 %v1017_v48, 0.0 }
 0x45f   :  { %v1126_v6 = vpack.c.bf16 %v1095_v30, %v1094_v11  ;;  %1058 = vmatmul.bf16.gmra.mxu3 %v3110_v27  ;;  %v947_v27 = vpop.f32.mrf.mxu0 }
 0x460   :  { %v948_v33 = vadd.f32 %v3310_v43, %v947_v27 }
 0x461   :  { %2677 = vmatmul.msk.bf16.vlgmr.msrb.gmra.mxu1 %vm1154_vm1, %v1126_v6 }
 0x462   :  { %v1019_v4 = vpop.f32.mrf.mxu3 }
 0x463   :  { %v1020_v44 = vadd.f32 %v1019_v4, %v931_v14 }
 0x465   :  { %v1096_v53 = vmax.f32 %v1020_v44, 0.0 }
 0x467   :  { %v950_v42 = vpop.f32.mrf.mxu0 }
 0x468   :  { %v951_v34 = vadd.f32 %v3310_v43, %v950_v42 }
 0x46a   :  { %v1021_v12 = vpop.f32.mrf.mxu3 }
 0x46b   :  { %v1022_v32 = vadd.f32 %v1021_v12, %v933_v0 }
 0x46d   :  { %v1097_v47 = vmax.f32 %v1022_v32, 0.0 }
 0x46f   :  { %v1127_v51 = vpack.c.bf16 %v1097_v47, %v1096_v53  ;;  %1063 = vmatmul.bf16.gmra.mxu3 %v3131_v52  ;;  %v952_v26 = vpop.f32.mrf.mxu0 }
 0x470   :  { %v953_v37 = vadd.f32 %v3310_v43, %v952_v26 }
 0x471   :  { %2678 = vmatmul.msk.bf16.gmra.mxu1 %vm1154_vm1, %v1127_v51 }
 0x472   :  { %v1024_v41 = vpop.f32.mrf.mxu3 }
 0x473   :  { %v1025_v8 = vadd.f32 %v1024_v41, %v936_v10 }
 0x475   :  { %v1098_v7 = vmax.f32 %v1025_v8, 0.0 }
 0x477   :  { %v955_v24 = vpop.f32.mrf.mxu0 }
 0x478   :  { %v956_v48 = vadd.f32 %v3310_v43, %v955_v24  ;;  %v3352_v24 = vld [vmem:[%s3602_s8] ss:$0 sm:$0xff] }
 0x47a   :  { %v1026_v62 = vpop.f32.mrf.mxu3 }
 0x47b   :  { %v1027_v54 = vadd.f32 %v1026_v62, %v938_v20 }
 0x47d   :  { %v1099_v57 = vmax.f32 %v1027_v54, 0.0 }
 0x47f   :  { %v1128_v49 = vpack.c.bf16 %v1099_v57, %v1098_v7  ;;  %1068 = vmatmul.bf16.gmra.mxu3 %v3152_v17  ;;  %v957_v36 = vpop.f32.mrf.mxu0 }
 0x480   :  { %v958_v30 = vadd.f32 %v3310_v43, %v957_v36 }
 0x481   :  { %2679 = vmatmul.msk.bf16.gmra.mxu1 %vm1154_vm1, %v1128_v49 }
 0x482   :  { %v1029_v52 = vpop.f32.mrf.mxu3 }
 0x483   :  { %v1030_v3 = vadd.f32 %v1029_v52, %v941_v21 }
 0x485   :  { %v1100_v61 = vmax.f32 %v1030_v3, 0.0 }
 0x487   :  { %v960_v29 = vpop.f32.mrf.mxu0 }
 0x488   :  { %v961_v12 = vadd.f32 %v3310_v43, %v960_v29 }
 0x48a   :  { %v1031_v38 = vpop.f32.mrf.mxu3 }
 0x48b   :  { %v1032_v55 = vadd.f32 %v1031_v38, %v943_v56 }
 0x48d   :  { %v1101_v59 = vmax.f32 %v1032_v55, 0.0 }
 0x48f   :  { %v1129_v18 = vpack.c.bf16 %v1101_v59, %v1100_v61  ;;  %1073 = vmatmul.bf16.gmra.mxu3 %v3173_v45  ;;  %v962_v25 = vpop.f32.mrf.mxu0 }
 0x490   :  { %v963_v53 = vadd.f32 %v3310_v43, %v962_v25 }
 0x491   :  { %2680 = vmatmul.msk.bf16.gmra.mxu1 %vm1154_vm1, %v1129_v18 }
 0x492   :  { %v1034_v17 = vpop.f32.mrf.mxu3 }
 0x493   :  { %v1035_v9 = vadd.f32 %v1034_v17, %v946_v2 }
 0x495   :  { %v1102_v28 = vmax.f32 %v1035_v9, 0.0 }
 0x497   :  { %v965_v60 = vpop.f32.mrf.mxu0 }
 0x49a   :  { %v1036_v16 = vpop.f32.mrf.mxu3 }
 0x49b   :  { %v1037_v22 = vadd.f32 %v1036_v16, %v948_v33 }
 0x49d   :  { %v1103_v13 = vmax.f32 %v1037_v22, 0.0 }
 0x49f   :  { %v1130_v19 = vpack.c.bf16 %v1103_v13, %v1102_v28  ;;  %1078 = vmatmul.bf16.gmra.mxu3 %v3194_v1  ;;  %v2766_v1 = vld [vmem:[%s3603_s9] sm:$0xff]  ;;  %v967_v39 = vpop.f32.mrf.mxu0 }
 0x4a0   :  { %1407 = vmatpush.bf16.msrb.mxu2 %v2766_v1  ;;  %v968_v54 = vadd.f32 %v3310_v43, %v967_v39 }
 0x4a1   :  { %2681 = vmatmul.msk.bf16.gmra.mxu1 %vm1154_vm1, %v1130_v19 }
 0x4a2   :  { %v1039_v45 = vpop.f32.mrf.mxu3 }
 0x4a3   :  { %v1040_v31 = vadd.f32 %v1039_v45, %v951_v34 }
 0x4a5   :  { %v1104_v50 = vmax.f32 %v1040_v31, 0.0 }
 0x4a7   :  { %v970_v0 = vpop.f32.mrf.mxu0 }
 0x4a8   :  { %v971_v55 = vadd.f32 %v3310_v43, %v970_v0 }
 0x4aa   :  { %v1041_v40 = vpop.f32.mrf.mxu3 }
 0x4ab   :  { %v1042_v46 = vadd.f32 %v1041_v40, %v953_v37 }
 0x4ad   :  { %v1105_v58 = vmax.f32 %v1042_v46, 0.0 }
 0x4af   :  { %v1131_v5 = vpack.c.bf16 %v1105_v58, %v1104_v50  ;;  %1083 = vmatmul.bf16.gmra.mxu3 %v3207_v15  ;;  %v972_v10 = vpop.f32.mrf.mxu0 }
 0x4b0   :  { %v973_v2 = vadd.f32 %v3310_v43, %v972_v10 }
 0x4b1   :  { %2682 = vmatmul.msk.bf16.gmra.mxu1 %vm1154_vm1, %v1131_v5 }
 0x4b2   :  { %v1044_v23 = vpop.f32.mrf.mxu3 }
 0x4b3   :  { %v1045_v11 = vadd.f32 %v1044_v23, %v956_v48 }
 0x4b5   :  { %v1106_v14 = vmax.f32 %v1045_v11, 0.0 }
 0x4b7   :  { %v975_v20 = vpop.f32.mrf.mxu0 }
 0x4b8   :  { %v976_v25 = vadd.f32 %v3310_v43, %v975_v20 }
 0x4ba   :  { %v1046_v6 = vpop.f32.mrf.mxu3 }
 0x4bb   :  { %v1047_v4 = vadd.f32 %v1046_v6, %v958_v30 }
 0x4bd   :  { %v1107_v35 = vmax.f32 %v1047_v4, 0.0 }
 0x4bf   :  { %v1132_v15 = vpack.c.bf16 %v1107_v35, %v1106_v14  ;;  %1088 = vmatmul.bf16.gmra.mxu3 %v3219_v63  ;;  %v966_v63 = vadd.f32 %v3310_v43, %v965_v60  ;;  %v977_v56 = vpop.f32.mrf.mxu0 }
 0x4c0   :  { %v978_v5 = vadd.f32 %v3310_v43, %v977_v56 }
 0x4c1   :  { %2683 = vmatmul.msk.bf16.gmra.mxu1 %vm1154_vm1, %v1132_v15 }
 0x4c2   :  { %v1049_v44 = vpop.f32.mrf.mxu3 }
 0x4c3   :  { %v1050_v32 = vadd.f32 %v1049_v44, %v961_v12 }
 0x4c5   :  { %v1108_v27 = vmax.f32 %v1050_v32, 0.0 }
 0x4c7   :  { %v980_v22 = vpop.f32.mrf.mxu0 }
 0x4c8   :  { %v981_v35 = vadd.f32 %v3310_v43, %v980_v22 }
 0x4ca   :  { %v1051_v47 = vpop.f32.mrf.mxu3 }
 0x4cb   :  { %v1052_v51 = vadd.f32 %v1051_v47, %v963_v53 }
 0x4cd   :  { %v1109_v41 = vmax.f32 %v1052_v51, 0.0 }
 0x4cf   :  { %v1133_v42 = vpack.c.bf16 %v1109_v41, %v1108_v27  ;;  %v982_v37 = vpop.f32.mrf.mxu0 }
 0x4d0   :  { %v983_v53 = vadd.f32 %v3310_v43, %v982_v37 }
 0x4d1   :  { %2684 = vmatmul.msk.bf16.gmra.mxu1 %vm1154_vm1, %v1133_v42 }
 0x4d2   :  { %v1054_v8 = vpop.f32.mrf.mxu3 }
 0x4d3   :  { %v1055_v62 = vadd.f32 %v1054_v8, %v966_v63 }
 0x4d5   :  { %v1110_v49 = vmax.f32 %v1055_v62, 0.0 }
 0x4d7   :  { %v985_v39 = vpop.f32.mrf.mxu0 }
 0x4da   :  { %v1056_v7 = vpop.f32.mrf.mxu3 }
 0x4db   :  { %v1057_v57 = vadd.f32 %v1056_v7, %v968_v54  ;;  %v986_v7 = vadd.f32 %v3310_v43, %v985_v39 }
 0x4dd   :  { %v1111_v26 = vmax.f32 %v1057_v57, 0.0 }
 0x4de   :  { %v1212_v52 = vpop.f32.mrf.mxu1 }
 0x4df   :  { %v1134_v21 = vpack.c.bf16 %v1111_v26, %v1110_v49  ;;  %v1213_v38 = vadd.f32 %v3352_v24, %v1212_v52  ;;  %v987_v51 = vpop.f32.mrf.mxu0 }
 0x4e1   :  { %2685 = vmatmul.msk.bf16.gmra.mxu1 %vm1154_vm1, %v1134_v21  ;;  %v1292_v18 = vmax.f32 %v1213_v38, 0.0 }
 0x4e2   :  { %v1059_v3 = vpop.f32.mrf.mxu3 }
 0x4e3   :  { %v1060_v17 = vadd.f32 %v1059_v3, %v971_v55  ;;  %v988_v3 = vadd.f32 %v3310_v43, %v987_v51 }
 0x4e5   :  { %v1112_v29 = vmax.f32 %v1060_v17, 0.0 }
 0x4e6   :  { %v1214_v61 = vpop.f32.mrf.mxu1 }
 0x4e7   :  { %v1215_v59 = vadd.f32 %v3352_v24, %v1214_v61  ;;  %v990_v62 = vpop.f32.mrf.mxu0 }
 0x4e9   :  { %v1293_v36 = vmax.f32 %v1215_v59, 0.0 }
 0x4ea   :  { %v1061_v9 = vpop.f32.mrf.mxu3 }
 0x4eb   :  { %v1324_v33 = vpack.c.bf16 %v1293_v36, %v1292_v18  ;;  %v1062_v16 = vadd.f32 %v1061_v9, %v973_v2 }
 0x4ed   :  { %v1113_v28 = vmax.f32 %v1062_v16, 0.0  ;;  %2697 = vmatmul.msk.bf16.vlgmr.msrb.gmra.mxu2 %vm1154_vm1, %v1324_v33  ;;  %v991_v33 = vadd.f32 %v3310_v43, %v990_v62 }
 0x4ee   :  { %v1217_v13 = vpop.f32.mrf.mxu1 }
 0x4ef   :  { %v1135_v19 = vpack.c.bf16 %v1113_v28, %v1112_v29  ;;  %v1218_v34 = vadd.f32 %v3352_v24, %v1217_v13  ;;  %v992_v17 = vpop.f32.mrf.mxu0 }
 0x4f1   :  { %2686 = vmatmul.msk.bf16.gmra.mxu1 %vm1154_vm1, %v1135_v19  ;;  %v1294_v46 = vmax.f32 %v1218_v34, 0.0 }
 0x4f2   :  { %v1064_v45 = vpop.f32.mrf.mxu3 }
 0x4f3   :  { %v1065_v50 = vadd.f32 %v1064_v45, %v976_v25  ;;  %v993_v45 = vadd.f32 %v3310_v43, %v992_v17 }
 0x4f5   :  { %v1114_v48 = vmax.f32 %v1065_v50, 0.0 }
 0x4f6   :  { %v1219_v31 = vpop.f32.mrf.mxu1 }
 0x4f7   :  { %v1220_v40 = vadd.f32 %v3352_v24, %v1219_v31  ;;  %v995_v29 = vpop.f32.mrf.mxu0 }
 0x4f9   :  { %v1295_v58 = vmax.f32 %v1220_v40, 0.0 }
 0x4fa   :  { %v1066_v1 = vpop.f32.mrf.mxu3 }
 0x4fb   :  { %v1325_v60 = vpack.c.bf16 %v1295_v58, %v1294_v46  ;;  %v1067_v23 = vadd.f32 %v1066_v1, %v978_v5 }
 0x4fd   :  { %v1115_v11 = vmax.f32 %v1067_v23, 0.0  ;;  %2698 = vmatmul.msk.bf16.gmra.mxu2 %vm1154_vm1, %v1325_v60  ;;  %v996_v60 = vadd.f32 %v3310_v43, %v995_v29 }
 0x4fe   :  { %v1222_v30 = vpop.f32.mrf.mxu1 }
 0x4ff   :  { %v1136_v6 = vpack.c.bf16 %v1115_v11, %v1114_v48  ;;  %v1223_v14 = vadd.f32 %v3352_v24, %v1222_v30  ;;  %v997_v5 = vpop.f32.mrf.mxu0 }
 0x500   :  { %v998_v39 = vadd.f32 %v3310_v43, %v997_v5  ;;  %v1522_v5 = vld [vmem:[%s3605_s2 + $0x8] sm:$0xff] }
 0x501   :  { %2687 = vmatmul.msk.bf16.gmra.mxu1 %vm1154_vm1, %v1136_v6  ;;  %v1296_v0 = vmax.f32 %v1223_v14, 0.0 }
 0x502   :  { %v1069_v4 = vpop.f32.mrf.mxu3 }
 0x503   :  { %v1070_v12 = vadd.f32 %v1069_v4, %v981_v35 }
 0x505   :  { %v1116_v10 = vmax.f32 %v1070_v12, 0.0 }
 0x506   :  { %v1224_v15 = vpop.f32.mrf.mxu1 }
 0x507   :  { %v1225_v44 = vadd.f32 %v3352_v24, %v1224_v15  ;;  %v1000_v15 = vpop.f32.mrf.mxu0 }
 0x508   :  { %v1001_v51 = vadd.f32 %v3310_v43, %v1000_v15 }
 0x509   :  { %v1297_v32 = vmax.f32 %v1225_v44, 0.0 }
 0x50a   :  { %v1071_v47 = vpop.f32.mrf.mxu3 }
 0x50b   :  { %v1326_v27 = vpack.c.bf16 %v1297_v32, %v1296_v0  ;;  %v1072_v41 = vadd.f32 %v1071_v47, %v983_v53 }
 0x50d   :  { %v1117_v42 = vmax.f32 %v1072_v41, 0.0  ;;  %2699 = vmatmul.msk.bf16.gmra.mxu2 %vm1154_vm1, %v1326_v27 }
 0x50e   :  { %v1227_v8 = vpop.f32.mrf.mxu1 }
 0x50f   :  { %v1137_v63 = vpack.c.bf16 %v1117_v42, %v1116_v10  ;;  %v1228_v54 = vadd.f32 %v3352_v24, %v1227_v8  ;;  %v1002_v41 = vpop.f32.mrf.mxu0 }
 0x511   :  { %2688 = vmatmul.msk.bf16.gmra.mxu1 %vm1154_vm1, %v1137_v63  ;;  %v1298_v26 = vmax.f32 %v1228_v54, 0.0 }
 0x512   :  { %v1074_v20 = vpop.f32.mrf.mxu3 }
 0x513   :  { %v1075_v52 = vadd.f32 %v1074_v20, %v986_v7  ;;  %v1003_v20 = vadd.f32 %v3310_v43, %v1002_v41  ;;  %v1524_v41 = vld [vmem:[%s3605_s2 + $0x18] sm:$0xff] }
 0x515   :  { %v1118_v61 = vmax.f32 %v1075_v52, 0.0 }
 0x516   :  { %v1229_v57 = vpop.f32.mrf.mxu1 }
 0x517   :  { %v1230_v49 = vadd.f32 %v3352_v24, %v1229_v57 }
 0x519   :  { %v1299_v21 = vmax.f32 %v1230_v49, 0.0 }
 0x51a   :  { %v1076_v56 = vpop.f32.mrf.mxu3 }
 0x51b   :  { %v1327_v38 = vpack.c.bf16 %v1299_v21, %v1298_v26  ;;  %v1077_v55 = vadd.f32 %v1076_v56, %v988_v3 }
 0x51d   :  { %v1119_v59 = vmax.f32 %v1077_v55, 0.0  ;;  %2700 = vmatmul.msk.bf16.gmra.mxu2 %vm1154_vm1, %v1327_v38 }
 0x51e   :  { %v1232_v18 = vpop.f32.mrf.mxu1 }
 0x51f   :  { %v1138_v36 = vpack.c.bf16 %v1119_v59, %v1118_v61  ;;  %v1233_v9 = vadd.f32 %v3352_v24, %v1232_v18 }
 0x521   :  { %2689 = vmatmul.msk.bf16.gmra.mxu1 %vm1154_vm1, %v1138_v36  ;;  %v1300_v28 = vmax.f32 %v1233_v9, 0.0 }
 0x522   :  { %v1079_v2 = vpop.f32.mrf.mxu3 }
 0x523   :  { %v1080_v13 = vadd.f32 %v1079_v2, %v991_v33  ;;  %v3406_v33 = vld [vmem:[%s3604_s10] ss:$0 sm:$0xff] }
 0x525   :  { %v1120_v37 = vmax.f32 %v1080_v13, 0.0 }
 0x526   :  { %v1234_v16 = vpop.f32.mrf.mxu1 }
 0x527   :  { %v1235_v22 = vadd.f32 %v3352_v24, %v1234_v16 }
 0x529   :  { %v1301_v19 = vmax.f32 %v1235_v22, 0.0 }
 0x52a   :  { %v1081_v34 = vpop.f32.mrf.mxu3 }
 0x52b   :  { %v1328_v25 = vpack.c.bf16 %v1301_v19, %v1300_v28  ;;  %v1082_v31 = vadd.f32 %v1081_v34, %v993_v45  ;;  %v1521_v28 = vld [vmem:[%s3605_s2] sm:$0xff] }
 0x52d   :  { %v1121_v40 = vmax.f32 %v1082_v31, 0.0  ;;  %2701 = vmatmul.msk.bf16.gmra.mxu2 %vm1154_vm1, %v1328_v25 }
 0x52e   :  { %v1237_v46 = vpop.f32.mrf.mxu1 }
 0x52f   :  { %v1139_v50 = vpack.c.bf16 %v1121_v40, %v1120_v37  ;;  %v1238_v1 = vadd.f32 %v3352_v24, %v1237_v46 }
 0x531   :  { %2690 = vmatmul.msk.bf16.gmra.mxu1 %vm1154_vm1, %v1139_v50  ;;  %v1302_v11 = vmax.f32 %v1238_v1, 0.0 }
 0x532   :  { %v1084_v58 = vpop.f32.mrf.mxu3 }
 0x533   :  { %v1085_v30 = vadd.f32 %v1084_v58, %v996_v60 }
 0x535   :  { %v1122_v44 = vmax.f32 %v1085_v30, 0.0 }
 0x536   :  { %v1239_v23 = vpop.f32.mrf.mxu1 }
 0x537   :  { %v1240_v48 = vadd.f32 %v3352_v24, %v1239_v23 }
 0x539   :  { %v1303_v6 = vmax.f32 %v1240_v48, 0.0 }
 0x53a   :  { %v1086_v4 = vpop.f32.mrf.mxu3 }
 0x53b   :  { %v1329_v14 = vpack.c.bf16 %v1303_v6, %v1302_v11  ;;  %v1087_v35 = vadd.f32 %v1086_v4, %v998_v39  ;;  %v1523_v4 = vld [vmem:[%s3605_s2 + $0x10] sm:$0xff] }
 0x53d   :  { %v1123_v0 = vmax.f32 %v1087_v35, 0.0  ;;  %2702 = vmatmul.msk.bf16.gmra.mxu2 %vm1154_vm1, %v1329_v14 }
 0x53e   :  { %v1242_v12 = vpop.f32.mrf.mxu1 }
 0x53f   :  { %v1140_v32 = vpack.c.bf16 %v1123_v0, %v1122_v44  ;;  %v1243_v47 = vadd.f32 %v3352_v24, %v1242_v12 }
 0x541   :  { %2691 = vmatmul.msk.bf16.gmra.mxu1 %vm1154_vm1, %v1140_v32  ;;  %v1304_v42 = vmax.f32 %v1243_v47, 0.0 }
 0x542   :  { %v1089_v53 = vpop.f32.mrf.mxu3 }
 0x543   :  { %v1090_v8 = vadd.f32 %v1089_v53, %v1001_v51 }
 0x545   :  { %v1124_v57 = vmax.f32 %v1090_v8, 0.0 }
 0x546   :  { %v1244_v27 = vpop.f32.mrf.mxu1 }
 0x547   :  { %v1245_v10 = vadd.f32 %v3352_v24, %v1244_v27 }
 0x549   :  { %v1305_v63 = vmax.f32 %v1245_v10, 0.0 }
 0x54a   :  { %v1091_v62 = vpop.f32.mrf.mxu3 }
 0x54b   :  { %v1330_v54 = vpack.c.bf16 %v1305_v63, %v1304_v42  ;;  %v1092_v7 = vadd.f32 %v1091_v62, %v1003_v20 }
 0x54d   :  { %v1125_v49 = vmax.f32 %v1092_v7, 0.0  ;;  %2703 = vmatmul.msk.bf16.gmra.mxu2 %vm1154_vm1, %v1330_v54 }
 0x54e   :  { %v1247_v26 = vpop.f32.mrf.mxu1 }
 0x54f   :  { %v1141_v52 = vpack.c.bf16 %v1125_v49, %v1124_v57  ;;  %v1248_v21 = vadd.f32 %v3352_v24, %v1247_v26  ;;  %v1525_v57 = vld [vmem:[%s3605_s2 + $0x20] sm:$0xff] }
 0x551   :  { %2692 = vmatmul.msk.bf16.gmra.mxu1 %vm1154_vm1, %v1141_v52  ;;  %v1306_v38 = vmax.f32 %v1248_v21, 0.0 }
 0x556   :  { %v1249_v3 = vpop.f32.mrf.mxu1 }
 0x557   :  { %v1250_v56 = vadd.f32 %v3352_v24, %v1249_v3 }
 0x559   :  { %v1307_v55 = vmax.f32 %v1250_v56, 0.0 }
 0x55b   :  { %v1331_v61 = vpack.c.bf16 %v1307_v55, %v1306_v38 }
 0x55d   :  { %2704 = vmatmul.msk.bf16.gmra.mxu2 %vm1154_vm1, %v1331_v61 }
 0x55e   :  { %v1252_v43 = vpop.f32.mrf.mxu1 }
 0x55f   :  { %v1253_v59 = vadd.f32 %v3352_v24, %v1252_v43 }
 0x561   :  { %v1308_v36 = vmax.f32 %v1253_v59, 0.0 }
 0x566   :  { %v1254_v18 = vpop.f32.mrf.mxu1 }
 0x567   :  { %v1255_v17 = vadd.f32 %v3352_v24, %v1254_v18  ;;  %v1526_v18 = vld [vmem:[%s3605_s2 + $0x28] sm:$0xff] }
 0x569   :  { %v1309_v2 = vmax.f32 %v1255_v17, 0.0 }
 0x56b   :  { %v1332_v9 = vpack.c.bf16 %v1309_v2, %v1308_v36 }
 0x56d   :  { %2705 = vmatmul.msk.bf16.gmra.mxu2 %vm1154_vm1, %v1332_v9 }
 0x56e   :  { %v1257_v16 = vpop.f32.mrf.mxu1 }
 0x56f   :  { %v1258_v19 = vadd.f32 %v3352_v24, %v1257_v16 }
 0x570   :  { %v1409_v22 = vpop.f32.mrf.mxu2 }
 0x571   :  { %v1410_v29 = vadd.f32 %v3406_v33, %v1409_v22  ;;  %v1310_v40 = vmax.f32 %v1258_v19, 0.0 }
 0x573   :  { %v1489_v13 = vmax.f32 %v1410_v29, 0.0 }
 0x575   :  { %v1553_v45 = vsub.f32 %v1489_v13, %v1521_v28  ;;  %v1527_v13 = vld [vmem:[%s3605_s2 + $0x30] sm:$0xff] }
 0x576   :  { %v1259_v34 = vpop.f32.mrf.mxu1 }
 0x577   :  { %v1260_v25 = vadd.f32 %v3352_v24, %v1259_v34  ;;  %v1585_v31 = vmul.f32 %v1553_v45, %v1553_v45 }
 0x578   :  { %v1411_v37 = vpop.f32.mrf.mxu2 }
 0x579   :  { %v1311_v46 = vmax.f32 %v1260_v25, 0.0  ;;  %v1412_v50 = vadd.f32 %v3406_v33, %v1411_v37  ;;  %v1618_v58 = vsel %vm1617_vm2, %v1585_v31, 0.0 }
 0x57a   :  { %1619 = vadd.xlane.f32.xlu0 %v1618_v58 }
 0x57b   :  { %v1333_v1 = vpack.c.bf16 %v1311_v46, %v1310_v40  ;;  %v1490_v60 = vmax.f32 %v1412_v50, 0.0 }
 0x57d   :  { %2706 = vmatmul.msk.bf16.gmra.mxu2 %vm1154_vm1, %v1333_v1  ;;  %v1554_v23 = vsub.f32 %v1490_v60, %v1522_v5  ;;  %v1528_v1 = vld [vmem:[%s3605_s2 + $0x38] sm:$0xff] }
 0x57e   :  { %v1262_v48 = vpop.f32.mrf.mxu1 }
 0x57f   :  { %v1586_v11 = vmul.f32 %v1554_v23, %v1554_v23  ;;  %v1263_v35 = vadd.f32 %v3352_v24, %v1262_v48 }
 0x580   :  { %v1414_v30 = vpop.f32.mrf.mxu2 }
 0x581   :  { %v1415_v6 = vadd.f32 %v3406_v33, %v1414_v30  ;;  %v1621_v39 = vsel %vm1617_vm2, %v1586_v11, 0.0  ;;  %v1312_v53 = vmax.f32 %v1263_v35, 0.0 }
 0x582   :  { %1622 = vadd.xlane.f32.xlu0 %v1621_v39 }
 0x583   :  { %v1491_v14 = vmax.f32 %v1415_v6, 0.0 }
 0x585   :  { %v1555_v15 = vsub.f32 %v1491_v14, %v1523_v4  ;;  %v1529_v14 = vld [vmem:[%s3605_s2 + $0x40] sm:$0xff] }
 0x586   :  { %v1264_v44 = vpop.f32.mrf.mxu1 }
 0x587   :  { %v1265_v0 = vadd.f32 %v3352_v24, %v1264_v44  ;;  %v1587_v12 = vmul.f32 %v1555_v15, %v1555_v15 }
 0x588   :  { %v1416_v32 = vpop.f32.mrf.mxu2 }
 0x589   :  { %v1313_v47 = vmax.f32 %v1265_v0, 0.0  ;;  %v1417_v51 = vadd.f32 %v3406_v33, %v1416_v32  ;;  %v1624_v27 = vsel %vm1617_vm2, %v1587_v12, 0.0 }
 0x58a   :  { %1625 = vadd.xlane.f32.xlu2 %v1624_v27 }
 0x58b   :  { %v1334_v10 = vpack.c.bf16 %v1313_v47, %v1312_v53  ;;  %v1492_v42 = vmax.f32 %v1417_v51, 0.0 }
 0x58d   :  { %2707 = vmatmul.msk.bf16.gmra.mxu2 %vm1154_vm1, %v1334_v10  ;;  %v1556_v8 = vsub.f32 %v1492_v42, %v1524_v41  ;;  %v1530_v10 = vld [vmem:[%s3605_s2 + $0x48] sm:$0xff] }
 0x58e   :  { %v1267_v63 = vpop.f32.mrf.mxu1 }
 0x58f   :  { %v1588_v20 = vmul.f32 %v1556_v8, %v1556_v8  ;;  %v1268_v26 = vadd.f32 %v3352_v24, %v1267_v63 }
 0x590   :  { %v1419_v62 = vpop.f32.mrf.mxu2 }
 0x591   :  { %v1420_v54 = vadd.f32 %v3406_v33, %v1419_v62  ;;  %v1627_v7 = vsel %vm1617_vm2, %v1588_v20, 0.0  ;;  %v1314_v55 = vmax.f32 %v1268_v26, 0.0 }
 0x592   :  { %1628 = vadd.xlane.f32.xlu1 %v1627_v7 }
 0x593   :  { %v1493_v49 = vmax.f32 %v1420_v54, 0.0 }
 0x595   :  { %v1557_v52 = vsub.f32 %v1493_v49, %v1525_v57  ;;  %v1531_v49 = vld [vmem:[%s3605_s2 + $0x50] sm:$0xff] }
 0x596   :  { %v1269_v21 = vpop.f32.mrf.mxu1 }
 0x597   :  { %v1270_v3 = vadd.f32 %v3352_v24, %v1269_v21  ;;  %v1589_v56 = vmul.f32 %v1557_v52, %v1557_v52 }
 0x598   :  { %v1421_v38 = vpop.f32.mrf.mxu2 }
 0x599   :  { %v1315_v61 = vmax.f32 %v1270_v3, 0.0  ;;  %v1422_v43 = vadd.f32 %v3406_v33, %v1421_v38  ;;  %v1630_v59 = vsel %vm1617_vm2, %v1589_v56, 0.0 }
 0x59a   :  { %1631 = vadd.xlane.f32.xlu2 %v1630_v59 }
 0x59b   :  { %v1335_v17 = vpack.c.bf16 %v1315_v61, %v1314_v55  ;;  %v1494_v36 = vmax.f32 %v1422_v43, 0.0 }
 0x59d   :  { %2708 = vmatmul.msk.bf16.gmra.mxu2 %vm1154_vm1, %v1335_v17  ;;  %v1558_v2 = vsub.f32 %v1494_v36, %v1526_v18  ;;  %v1532_v17 = vld [vmem:[%s3605_s2 + $0x58] sm:$0xff] }
 0x59e   :  { %v1272_v9 = vpop.f32.mrf.mxu1 }
 0x59f   :  { %v1590_v16 = vmul.f32 %v1558_v2, %v1558_v2  ;;  %v1273_v45 = vadd.f32 %v3352_v24, %v1272_v9 }
 0x5a0   :  { %v1424_v22 = vpop.f32.mrf.mxu2 }
 0x5a1   :  { %v1425_v29 = vadd.f32 %v3406_v33, %v1424_v22  ;;  %v1633_v28 = vsel %vm1617_vm2, %v1590_v16, 0.0  ;;  %v1316_v46 = vmax.f32 %v1273_v45, 0.0 }
 0x5a2   :  { %1634 = vadd.xlane.f32.xlu0 %v1633_v28 }
 0x5a3   :  { %v1495_v19 = vmax.f32 %v1425_v29, 0.0 }
 0x5a5   :  { %v1559_v34 = vsub.f32 %v1495_v19, %v1527_v13  ;;  %v1533_v19 = vld [vmem:[%s3605_s2 + $0x60] sm:$0xff] }
 0x5a6   :  { %v1274_v25 = vpop.f32.mrf.mxu1 }
 0x5a7   :  { %v1275_v31 = vadd.f32 %v3352_v24, %v1274_v25  ;;  %v1591_v37 = vmul.f32 %v1559_v34, %v1559_v34 }
 0x5a8   :  { %v1426_v40 = vpop.f32.mrf.mxu2 }
 0x5a9   :  { %v1317_v50 = vmax.f32 %v1275_v31, 0.0  ;;  %v1427_v58 = vadd.f32 %v3406_v33, %v1426_v40  ;;  %v1636_v5 = vsel %vm1617_vm2, %v1591_v37, 0.0 }
 0x5aa   :  { %1637 = vadd.xlane.f32.xlu1 %v1636_v5 }
 0x5ab   :  { %v1336_v60 = vpack.c.bf16 %v1317_v50, %v1316_v46  ;;  %v1496_v23 = vmax.f32 %v1427_v58, 0.0 }
 0x5ad   :  { %2709 = vmatmul.msk.bf16.gmra.mxu2 %vm1154_vm1, %v1336_v60  ;;  %v1560_v48 = vsub.f32 %v1496_v23, %v1528_v1  ;;  %v1534_v60 = vld [vmem:[%s3605_s2 + $0x68] sm:$0xff] }
 0x5ae   :  { %v1277_v11 = vpop.f32.mrf.mxu1 }
 0x5af   :  { %v1592_v30 = vmul.f32 %v1560_v48, %v1560_v48  ;;  %v1278_v15 = vadd.f32 %v3352_v24, %v1277_v11 }
 0x5b0   :  { %v1429_v6 = vpop.f32.mrf.mxu2 }
 0x5b1   :  { %v1430_v39 = vadd.f32 %v3406_v33, %v1429_v6  ;;  %v1639_v4 = vsel %vm1617_vm2, %v1592_v30, 0.0  ;;  %v1318_v47 = vmax.f32 %v1278_v15, 0.0 }
 0x5b2   :  { %1640 = vadd.xlane.f32.xlu2 %v1639_v4  ;;  %v1535_v4 = vld [vmem:[%s3605_s2 + $0x70] sm:$0xff] }
 0x5b3   :  { %v1497_v35 = vmax.f32 %v1430_v39, 0.0 }
 0x5b5   :  { %v1561_v44 = vsub.f32 %v1497_v35, %v1529_v14 }
 0x5b6   :  { %v1279_v0 = vpop.f32.mrf.mxu1 }
 0x5b7   :  { %v1280_v12 = vadd.f32 %v3352_v24, %v1279_v0  ;;  %v1593_v32 = vmul.f32 %v1561_v44, %v1561_v44 }
 0x5b8   :  { %v1431_v53 = vpop.f32.mrf.mxu2 }
 0x5b9   :  { %v1319_v51 = vmax.f32 %v1280_v12, 0.0  ;;  %v1432_v27 = vadd.f32 %v3406_v33, %v1431_v53  ;;  %v1642_v41 = vsel %vm1617_vm2, %v1593_v32, 0.0  ;;  %v1536_v32 = vld [vmem:[%s3605_s2 + $0x78] sm:$0xff] }
 0x5ba   :  { %1643 = vadd.xlane.f32.xlu1 %v1642_v41 }
 0x5bb   :  { %v1337_v42 = vpack.c.bf16 %v1319_v51, %v1318_v47  ;;  %v1498_v8 = vmax.f32 %v1432_v27, 0.0 }
 0x5bd   :  { %2710 = vmatmul.msk.bf16.gmra.mxu2 %vm1154_vm1, %v1337_v42  ;;  %v1562_v63 = vsub.f32 %v1498_v8, %v1530_v10  ;;  %v1537_v42 = vld [vmem:[%s3605_s2 + $0x80] sm:$0xff] }
 0x5be   :  { %v1282_v20 = vpop.f32.mrf.mxu1 }
 0x5bf   :  { %v1594_v62 = vmul.f32 %v1562_v63, %v1562_v63  ;;  %v1283_v52 = vadd.f32 %v3352_v24, %v1282_v20 }
 0x5c0   :  { %v1434_v54 = vpop.f32.mrf.mxu2 }
 0x5c1   :  { %v1435_v7 = vadd.f32 %v3406_v33, %v1434_v54  ;;  %v1645_v57 = vsel %vm1617_vm2, %v1594_v62, 0.0  ;;  %v1320_v61 = vmax.f32 %v1283_v52, 0.0 }
 0x5c2   :  { %1646 = vadd.xlane.f32.xlu1 %v1645_v57 }
 0x5c3   :  { %v1499_v26 = vmax.f32 %v1435_v7, 0.0 }
 0x5c5   :  { %v1563_v21 = vsub.f32 %v1499_v26, %v1531_v49  ;;  %v1538_v49 = vld [vmem:[%s3605_s2 + $0x88] sm:$0xff] }
 0x5c6   :  { %v1284_v3 = vpop.f32.mrf.mxu1 }
 0x5c7   :  { %v1285_v56 = vadd.f32 %v3352_v24, %v1284_v3  ;;  %v1595_v38 = vmul.f32 %v1563_v21, %v1563_v21 }
 0x5c8   :  { %v1436_v55 = vpop.f32.mrf.mxu2 }
 0x5c9   :  { %v1321_v43 = vmax.f32 %v1285_v56, 0.0  ;;  %v1437_v59 = vadd.f32 %v3406_v33, %v1436_v55  ;;  %v1648_v18 = vsel %vm1617_vm2, %v1595_v38, 0.0 }
 0x5ca   :  { %1649 = vadd.xlane.f32.xlu1 %v1648_v18 }
 0x5cb   :  { %v1338_v36 = vpack.c.bf16 %v1321_v43, %v1320_v61  ;;  %v1500_v2 = vmax.f32 %v1437_v59, 0.0  ;;  %v1539_v43 = vld [vmem:[%s3605_s2 + $0x90] sm:$0xff] }
 0x5cd   :  { %2711 = vmatmul.msk.bf16.gmra.mxu2 %vm1154_vm1, %v1338_v36  ;;  %v1564_v9 = vsub.f32 %v1500_v2, %v1532_v17 }
 0x5ce   :  { %v1287_v16 = vpop.f32.mrf.mxu1 }
 0x5cf   :  { %v1596_v22 = vmul.f32 %v1564_v9, %v1564_v9  ;;  %v1288_v34 = vadd.f32 %v3352_v24, %v1287_v16 }
 0x5d0   :  { %v1439_v29 = vpop.f32.mrf.mxu2 }
 0x5d1   :  { %v1440_v28 = vadd.f32 %v3406_v33, %v1439_v29  ;;  %v1651_v13 = vsel %vm1617_vm2, %v1596_v22, 0.0  ;;  %v1322_v50 = vmax.f32 %v1288_v34, 0.0 }
 0x5d2   :  { %1652 = vadd.xlane.f32.xlu0 %v1651_v13  ;;  %v1540_v13 = vld [vmem:[%s3605_s2 + $0x98] sm:$0xff] }
 0x5d3   :  { %v1501_v45 = vmax.f32 %v1440_v28, 0.0 }
 0x5d5   :  { %v1565_v25 = vsub.f32 %v1501_v45, %v1533_v19 }
 0x5d6   :  { %v1289_v31 = vpop.f32.mrf.mxu1 }
 0x5d7   :  { %v1290_v37 = vadd.f32 %v3352_v24, %v1289_v31  ;;  %v1597_v40 = vmul.f32 %v1565_v25, %v1565_v25 }
 0x5d8   :  { %v1441_v46 = vpop.f32.mrf.mxu2 }
 0x5d9   :  { %v1323_v58 = vmax.f32 %v1290_v37, 0.0  ;;  %v1442_v5 = vadd.f32 %v3406_v33, %v1441_v46  ;;  %v1654_v1 = vsel %vm1617_vm2, %v1597_v40, 0.0  ;;  %v1541_v40 = vld [vmem:[%s3605_s2 + $0xa0] sm:$0xff] }
 0x5da   :  { %1655 = vadd.xlane.f32.xlu1 %v1654_v1 }
 0x5db   :  { %v1339_v23 = vpack.c.bf16 %v1323_v58, %v1322_v50  ;;  %v1502_v48 = vmax.f32 %v1442_v5, 0.0 }
 0x5dd   :  { %2712 = vmatmul.msk.bf16.gmra.mxu2 %vm1154_vm1, %v1339_v23  ;;  %v1566_v11 = vsub.f32 %v1502_v48, %v1534_v60 }
 0x5df   :  { %v1598_v30 = vmul.f32 %v1566_v11, %v1566_v11  ;;  %v1542_v11 = vld [vmem:[%s3605_s2 + $0xa8] sm:$0xff] }
 0x5e0   :  { %v1444_v24 = vpop.f32.mrf.mxu2 }
 0x5e1   :  { %v1445_v6 = vadd.f32 %v3406_v33, %v1444_v24  ;;  %v1657_v39 = vsel %vm1617_vm2, %v1598_v30, 0.0 }
 0x5e2   :  { %1658 = vadd.xlane.f32.xlu2 %v1657_v39 }
 0x5e3   :  { %v1503_v14 = vmax.f32 %v1445_v6, 0.0 }
 0x5e5   :  { %v1567_v35 = vsub.f32 %v1503_v14, %v1535_v4 }
 0x5e7   :  { %v1599_v15 = vmul.f32 %v1567_v35, %v1567_v35 }
 0x5e8   :  { %v1446_v44 = vpop.f32.mrf.mxu2 }
 0x5e9   :  { %v1447_v0 = vadd.f32 %v3406_v33, %v1446_v44  ;;  %v1660_v12 = vsel %vm1617_vm2, %v1599_v15, 0.0 }
 0x5ea   :  { %1661 = vadd.xlane.f32.xlu0 %v1660_v12  ;;  %v1543_v12 = vld [vmem:[%s3605_s2 + $0xb0] sm:$0xff] }
 0x5eb   :  { %v1504_v53 = vmax.f32 %v1447_v0, 0.0 }
 0x5ed   :  { %v1568_v47 = vsub.f32 %v1504_v53, %v1536_v32  ;;  %v1620_v20 = vpop.xlane.xlu0 %1619 }
 0x5ef   :  { %v1600_v51 = vmul.f32 %v1568_v47, %v1568_v47 }
 0x5f0   :  { %v1449_v27 = vpop.f32.mrf.mxu2 }
 0x5f1   :  { %v1450_v41 = vadd.f32 %v3406_v33, %v1449_v27  ;;  %v1663_v10 = vsel %vm1617_vm2, %v1600_v51, 0.0 }
 0x5f2   :  { %1664 = vadd.xlane.f32.xlu1 %v1663_v10 }
 0x5f3   :  { %v1505_v8 = vmax.f32 %v1450_v41, 0.0 }
 0x5f5   :  { %v1569_v63 = vsub.f32 %v1505_v8, %v1537_v42  ;;  %v1623_v3 = vpop.xlane.xlu0 %1622  ;;  %v1545_v42 = vld [vmem:[%s3605_s2 + $0xc0] sm:$0xff] }
 0x5f6   :  { %v1875_v59 = vadd.f32 %v1623_v3, %v1620_v20 }
 0x5f7   :  { %v1601_v62 = vmul.f32 %v1569_v63, %v1569_v63 }
 0x5f8   :  { %v1451_v54 = vpop.f32.mrf.mxu2 }
 0x5f9   :  { %v1452_v7 = vadd.f32 %v3406_v33, %v1451_v54  ;;  %v1666_v57 = vsel %vm1617_vm2, %v1601_v62, 0.0 }
 0x5fa   :  { %1667 = vadd.xlane.f32.xlu2 %v1666_v57  ;;  %v1546_v57 = vld [vmem:[%s3605_s2 + $0xc8] sm:$0xff] }
 0x5fb   :  { %v1506_v26 = vmax.f32 %v1452_v7, 0.0 }
 0x5fd   :  { %v1570_v52 = vsub.f32 %v1506_v26, %v1538_v49  ;;  %v1626_v61 = vpop.xlane.xlu2 %1625 }
 0x5fe   :  { %v1876_v17 = vadd.f32 %v1875_v59, %v1626_v61 }
 0x5ff   :  { %v1602_v21 = vmul.f32 %v1570_v52, %v1570_v52 }
 0x600   :  { %v1454_v56 = vpop.f32.mrf.mxu2 }
 0x601   :  { %v1455_v38 = vadd.f32 %v3406_v33, %v1454_v56  ;;  %v1669_v55 = vsel %vm1617_vm2, %v1602_v21, 0.0 }
 0x602   :  { %1670 = vadd.xlane.f32.xlu0 %v1669_v55 }
 0x603   :  { %v1507_v18 = vmax.f32 %v1455_v38, 0.0  ;;  %v1547_v38 = vld [vmem:[%s3605_s2 + $0xd0] sm:$0xff] }
 0x605   :  { %v1571_v36 = vsub.f32 %v1507_v18, %v1539_v43  ;;  %v1629_v2 = vpop.xlane.xlu1 %1628 }
 0x606   :  { %v1877_v9 = vadd.f32 %v1876_v17, %v1629_v2 }
 0x607   :  { %v1603_v16 = vmul.f32 %v1571_v36, %v1571_v36  ;;  %v1548_v36 = vld [vmem:[%s3605_s2 + $0xd8] sm:$0xff] }
 0x608   :  { %v1456_v22 = vpop.f32.mrf.mxu2 }
 0x609   :  { %v1457_v29 = vadd.f32 %v3406_v33, %v1456_v22  ;;  %v1672_v28 = vsel %vm1617_vm2, %v1603_v16, 0.0 }
 0x60a   :  { %1673 = vadd.xlane.f32.xlu2 %v1672_v28 }
 0x60b   :  { %v1508_v19 = vmax.f32 %v1457_v29, 0.0 }
 0x60d   :  { %v1572_v45 = vsub.f32 %v1508_v19, %v1540_v13  ;;  %v1632_v5 = vpop.xlane.xlu2 %1631  ;;  %v1549_v19 = vld [vmem:[%s3605_s2 + $0xe0] sm:$0xff] }
 0x60e   :  { %v1878_v30 = vadd.f32 %v1877_v9, %v1632_v5  ;;  %v1550_v5 = vld [vmem:[%s3605_s2 + $0xe8] sm:$0xff] }
 0x60f   :  { %v1604_v34 = vmul.f32 %v1572_v45, %v1572_v45 }
 0x610   :  { %v1459_v25 = vpop.f32.mrf.mxu2 }
 0x611   :  { %v1460_v31 = vadd.f32 %v3406_v33, %v1459_v25  ;;  %v1675_v37 = vsel %vm1617_vm2, %v1604_v34, 0.0 }
 0x612   :  { %1676 = vadd.xlane.f32.xlu0 %v1675_v37 }
 0x613   :  { %v1509_v46 = vmax.f32 %v1460_v31, 0.0  ;;  %v1544_v31 = vld [vmem:[%s3605_s2 + $0xb8] sm:$0xff] }
 0x615   :  { %v1573_v50 = vsub.f32 %v1509_v46, %v1541_v40  ;;  %v1635_v48 = vpop.xlane.xlu0 %1634 }
 0x616   :  { %v1879_v6 = vadd.f32 %v1878_v30, %v1635_v48 }
 0x617   :  { %v1605_v58 = vmul.f32 %v1573_v50, %v1573_v50 }
 0x618   :  { %v1461_v1 = vpop.f32.mrf.mxu2 }
 0x619   :  { %v1462_v60 = vadd.f32 %v3406_v33, %v1461_v1  ;;  %v1678_v23 = vsel %vm1617_vm2, %v1605_v58, 0.0 }
 0x61a   :  { %1679 = vadd.xlane.f32.xlu1 %v1678_v23 }
 0x61b   :  { %v1510_v24 = vmax.f32 %v1462_v60, 0.0 }
 0x61d   :  { %v1574_v39 = vsub.f32 %v1510_v24, %v1542_v11  ;;  %v1638_v4 = vpop.xlane.xlu1 %1637 }
 0x61e   :  { %v3538_v14 = vadd.f32 %v1879_v6, %v1638_v4 }
 0x61f   :  { %v1606_v35 = vmul.f32 %v1574_v39, %v1574_v39  ;;  %v1551_v39 = vld [vmem:[%s3605_s2 + $0xf0] sm:$0xff] }
 0x620   :  { %v1464_v15 = vpop.f32.mrf.mxu2 }
 0x621   :  { %v1465_v44 = vadd.f32 %v3406_v33, %v1464_v15  ;;  %v1681_v0 = vsel %vm1617_vm2, %v1606_v35, 0.0 }
 0x622   :  { %1682 = vadd.xlane.f32.xlu2 %v1681_v0 }
 0x623   :  { %v1511_v32 = vmax.f32 %v1465_v44, 0.0 }
 0x625   :  { %v1575_v53 = vsub.f32 %v1511_v32, %v1543_v12  ;;  %v1552_v32 = vld [vmem:[%s3605_s2 + $0xf8] sm:$0xff] }
 0x627   :  { %v1607_v47 = vmul.f32 %v1575_v53, %v1575_v53 }
 0x628   :  { %v1466_v51 = vpop.f32.mrf.mxu2 }
 0x629   :  { %v1684_v27 = vsel %vm1617_vm2, %v1607_v47, 0.0  ;;  %v1467_v29 = vadd.f32 %v3406_v33, %v1466_v51 }
 0x62a   :  { %1685 = vadd.xlane.f32.xlu0 %v1684_v27 }
 0x62b   :  { %v1512_v34 = vmax.f32 %v1467_v29, 0.0 }
 0x62d   :  { %v1576_v58 = vsub.f32 %v1512_v34, %v1544_v31 }
 0x62f   :  { %v1608_v60 = vmul.f32 %v1576_v58, %v1576_v58 }
 0x630   :  { %v1469_v41 = vpop.f32.mrf.mxu2 }
 0x631   :  { %v1470_v10 = vadd.f32 %v3406_v33, %v1469_v41  ;;  %v1687_v24 = vsel %vm1617_vm2, %v1608_v60, 0.0 }
 0x633   :  { %v1513_v8 = vmax.f32 %v1470_v10, 0.0  ;;  %v1644_v10 = vpop.xlane.xlu1 %1643 }
 0x635   :  { %v1577_v63 = vsub.f32 %v1513_v8, %v1545_v42  ;;  %v1641_v8 = vpop.xlane.xlu2 %1640 }
 0x637   :  { %v1609_v20 = vmul.f32 %v1577_v63, %v1577_v63 }
 0x638   :  { %v1471_v62 = vpop.f32.mrf.mxu2 }
 0x639   :  { %v1472_v54 = vadd.f32 %v3406_v33, %v1471_v62  ;;  %v1690_v7 = vsel %vm1617_vm2, %v1609_v20, 0.0 }
 0x63a   :  { %1691 = vadd.xlane.f32.xlu2 %v1690_v7 }
 0x63b   :  { %v1514_v49 = vmax.f32 %v1472_v54, 0.0  ;;  %v1647_v63 = vpop.xlane.xlu1 %1646 }
 0x63d   :  { %v1578_v26 = vsub.f32 %v1514_v49, %v1546_v57 }
 0x63f   :  { %v1610_v52 = vmul.f32 %v1578_v26, %v1578_v26 }
 0x640   :  { %v1474_v21 = vpop.f32.mrf.mxu2 }
 0x641   :  { %v1475_v3 = vadd.f32 %v3406_v33, %v1474_v21  ;;  %v1693_v56 = vsel %vm1617_vm2, %v1610_v52, 0.0 }
 0x642   :  { %1694 = vadd.xlane.f32.xlu0 %v1693_v56  ;;  %v2050_v56 = vadd.f32 %v1647_v63, %v1644_v10 }
 0x643   :  { %v1515_v55 = vmax.f32 %v1475_v3, 0.0  ;;  %v1650_v62 = vpop.xlane.xlu1 %1649 }
 0x645   :  { %v1579_v61 = vsub.f32 %v1515_v55, %v1547_v38  ;;  %v1653_v41 = vpop.xlane.xlu0 %1652  ;;  %v2051_v55 = vadd.f32 %v2050_v56, %v1650_v62 }
 0x647   :  { %v1611_v43 = vmul.f32 %v1579_v61, %v1579_v61 }
 0x648   :  { %v1476_v59 = vpop.f32.mrf.mxu2 }
 0x649   :  { %v1477_v18 = vadd.f32 %v3406_v33, %v1476_v59  ;;  %v1696_v17 = vsel %vm1617_vm2, %v1611_v43, 0.0 }
 0x64a   :  { %1697 = vadd.xlane.f32.xlu1 %v1696_v17 }
 0x64b   :  { %v1516_v2 = vmax.f32 %v1477_v18, 0.0  ;;  %v2052_v18 = vadd.f32 %v2051_v55, %v1653_v41 }
 0x64d   :  { %v1580_v9 = vsub.f32 %v1516_v2, %v1548_v36  ;;  %v1656_v57 = vpop.xlane.xlu1 %1655 }
 0x64e   :  { %v2053_v36 = vadd.f32 %v2052_v18, %v1656_v57 }
 0x64f   :  { %v1612_v16 = vmul.f32 %v1580_v9, %v1580_v9 }
 0x650   :  { %v1479_v22 = vpop.f32.mrf.mxu2 }
 0x651   :  { %v1480_v28 = vadd.f32 %v3406_v33, %v1479_v22  ;;  %v1699_v13 = vsel %vm1617_vm2, %v1612_v16, 0.0 }
 0x652   :  { %1700 = vadd.xlane.f32.xlu2 %v1699_v13 }
 0x653   :  { %v1517_v45 = vmax.f32 %v1480_v28, 0.0  ;;  %v1881_v28 = vadd.f32 %v3538_v14, %v1641_v8 }
 0x655   :  { %v1581_v25 = vsub.f32 %v1517_v45, %v1549_v19  ;;  %v1906_v31 = vrot.slane %v1881_v28, 4 }
 0x657   :  { %v1613_v37 = vmul.f32 %v1581_v25, %v1581_v25 }
 0x658   :  { %v1481_v40 = vpop.f32.mrf.mxu2 }
 0x659   :  { %v1482_v46 = vadd.f32 %v3406_v33, %v1481_v40  ;;  %v1702_v50 = vsel %vm1617_vm2, %v1613_v37, 0.0 }
 0x65a   :  { %1703 = vadd.xlane.f32.xlu0 %v1702_v50 }
 0x65b   :  { %v1518_v1 = vmax.f32 %v1482_v46, 0.0 }
 0x65d   :  { %v1582_v23 = vsub.f32 %v1518_v1, %v1550_v5  ;;  %v1662_v42 = vpop.xlane.xlu0 %1661  ;;  %v1907_v5 = vadd.f32 %v1906_v31, %v1881_v28 }
 0x65f   :  { %v1614_v48 = vmul.f32 %v1582_v23, %v1582_v23 }
 0x660   :  { %v1484_v11 = vpop.f32.mrf.mxu2 }
 0x661   :  { %v1485_v30 = vadd.f32 %v3406_v33, %v1484_v11  ;;  %v1705_v6 = vsel %vm1617_vm2, %v1614_v48, 0.0 }
 0x662   :  { %1688 = vadd.xlane.f32.xlu0 %v1687_v24  ;;  %1706 = vadd.xlane.f32.xlu1 %v1705_v6 }
 0x663   :  { %v1519_v4 = vmax.f32 %v1485_v30, 0.0  ;;  %v1908_v30 = vrot.slane %v1907_v5, 2 }
 0x665   :  { %v1583_v35 = vsub.f32 %v1519_v4, %v1551_v39  ;;  %v1665_v52 = vpop.xlane.xlu1 %1664 }
 0x667   :  { %v1615_v15 = vmul.f32 %v1583_v35, %v1583_v35  ;;  %v1909_v35 = vadd.f32 %v1908_v30, %v1907_v5 }
 0x668   :  { %v1486_v44 = vpop.f32.mrf.mxu2 }
 0x669   :  { %v1487_v0 = vadd.f32 %v3406_v33, %v1486_v44  ;;  %v1708_v12 = vsel %vm1617_vm2, %v1615_v15, 0.0  ;;  %v1659_v33 = vpop.xlane.xlu2 %1658  ;;  %v1714_v44 = vlaneseq }
 0x66a   :  { %1709 = vadd.xlane.f32.xlu2 %v1708_v12  ;;  %v2054_v16 = vadd.f32 %v2053_v36, %v1659_v33 }
 0x66b   :  { %v1520_v53 = vmax.f32 %v1487_v0, 0.0 }
 0x66c   :  { %v2055_v29 = vadd.f32 %v2054_v16, %v1662_v42 }
 0x66d   :  { %v1584_v47 = vsub.f32 %v1520_v53, %v1552_v32 }
 0x66e   :  { %v2056_v34 = vadd.f32 %v2055_v29, %v1665_v52 }
 0x66f   :  { %v1616_v51 = vmul.f32 %v1584_v47, %v1584_v47  ;;  %v1910_v47 = vrot.slane %v1909_v35, 1 }
 0x670   :  { %v2073_v40 = vrot.slane %v2056_v34, 4 }
 0x671   :  { %v1711_v27 = vsel %vm1617_vm2, %v1616_v51, 0.0  ;;  %v1668_v7 = vpop.xlane.xlu2 %1667  ;;  %v1715_v51 = vshrl.u32 %v1714_v44, 7  ;;  %v1911_v8 = vadd.f32 %v1910_v47, %v1909_v35 }
 0x672   :  { %1712 = vadd.xlane.f32.xlu1 %v1711_v27  ;;  %v2074_v60 = vadd.f32 %v2073_v40, %v2056_v34 }
 0x673   :  { %vm1912_vm3 = vcmp.eq.s32.totalorder %v1715_v51, 0  ;;  %vm2079_vm4 = vcmp.eq.s32.totalorder %v1715_v51, 1  ;;  %vm2246_vm5 = vcmp.eq.s32.totalorder %v1715_v51, 2  ;;  %vm2413_vm6 = vcmp.eq.s32.totalorder %v1715_v51, 3 }
 0x674   :  { %v2075_v14 = vrot.slane %v2074_v60, 2 }
 0x675   :  { %v1671_v20 = vpop.xlane.xlu0 %1670 }
 0x676   :  { %v2225_v38 = vadd.f32 %v1671_v20, %v1668_v7  ;;  %v2076_v0 = vadd.f32 %v2075_v14, %v2074_v60 }
 0x678   :  { %v2077_v27 = vrot.slane %v2076_v0, 1 }
 0x67a   :  { %v2078_v63 = vadd.f32 %v2077_v27, %v2076_v0 }
 0x67d   :  { %v1674_v26 = vpop.xlane.xlu2 %1673 }
 0x67e   :  { %v2226_v61 = vadd.f32 %v2225_v38, %v1674_v26 }
 0x685   :  { %v1677_v54 = vpop.xlane.xlu0 %1676 }
 0x686   :  { %v2227_v17 = vadd.f32 %v2226_v61, %v1677_v54  ;;  %v1913_v54 = vsel %vm1912_vm3, %v1911_v8, 0.0 }
 0x687   :  { %v2080_v7 = vsel %vm2079_vm4, %v2078_v63, %v1913_v54 }
 0x68d   :  { %v1680_v43 = vpop.xlane.xlu1 %1679 }
 0x68e   :  { %v2228_v2 = vadd.f32 %v2227_v17, %v1680_v43 }
 0x695   :  { %v1683_v3 = vpop.xlane.xlu2 %1682 }
 0x696   :  { %v2229_v22 = vadd.f32 %v2228_v2, %v1683_v3 }
 0x69d   :  { %v1686_v49 = vpop.xlane.xlu0 %1685 }
 0x69e   :  { %v2230_v19 = vadd.f32 %v2229_v22, %v1686_v49 }
 0x6ad   :  { %v1692_v9 = vpop.xlane.xlu2 %1691 }
 0x6b5   :  { %v1695_v21 = vpop.xlane.xlu0 %1694 }
 0x6b6   :  { %v2400_v46 = vadd.f32 %v1695_v21, %v1692_v9 }
 0x6bd   :  { %v1698_v13 = vpop.xlane.xlu1 %1697 }
 0x6be   :  { %v2401_v58 = vadd.f32 %v2400_v46, %v1698_v13 }
 0x6c5   :  { %v1701_v37 = vpop.xlane.xlu2 %1700 }
 0x6c6   :  { %v2402_v23 = vadd.f32 %v2401_v58, %v1701_v37 }
 0x6cd   :  { %v1704_v59 = vpop.xlane.xlu0 %1703 }
 0x6ce   :  { %v2403_v11 = vadd.f32 %v2402_v23, %v1704_v59 }
 0x6d5   :  { %v1689_v45 = vpop.xlane.xlu0 %1688  ;;  %v1707_v1 = vpop.xlane.xlu1 %1706 }
 0x6d6   :  { %v2231_v25 = vadd.f32 %v2230_v19, %v1689_v45  ;;  %v2404_v6 = vadd.f32 %v2403_v11, %v1707_v1 }
 0x6d8   :  { %v2240_v50 = vrot.slane %v2231_v25, 4 }
 0x6da   :  { %v2241_v48 = vadd.f32 %v2240_v50, %v2231_v25 }
 0x6dc   :  { %v2242_v39 = vrot.slane %v2241_v48, 2 }
 0x6dd   :  { %v1710_v24 = vpop.xlane.xlu2 %1709 }
 0x6de   :  { %v2405_v4 = vadd.f32 %v2404_v6, %v1710_v24  ;;  %v2243_v32 = vadd.f32 %v2242_v39, %v2241_v48 }
 0x6e0   :  { %v2244_v10 = vrot.slane %v2243_v32, 1 }
 0x6e2   :  { %v2245_v33 = vadd.f32 %v2244_v10, %v2243_v32 }
 0x6e4   :  { %v2247_v49 = vsel %vm2246_vm5, %v2245_v33, %v2080_v7 }
 0x6e5   :  { %v1713_v15 = vpop.xlane.xlu1 %1712 }
 0x6e6   :  { %v2406_v12 = vadd.f32 %v2405_v4, %v1713_v15 }
 0x6e8   :  { %v2407_v53 = vrot.slane %v2406_v12, 4 }
 0x6ea   :  { %v2408_v41 = vadd.f32 %v2407_v53, %v2406_v12 }
 0x6ec   :  { %v2409_v42 = vrot.slane %v2408_v41, 2 }
 0x6ee   :  { %v2410_v20 = vadd.f32 %v2409_v42, %v2408_v41 }
 0x6f0   :  { %v2411_v62 = vrot.slane %v2410_v20, 1 }
 0x6f2   :  { %v2412_v57 = vadd.f32 %v2411_v62, %v2410_v20 }
 0x6f4   :  { %v2414_v26 = vsel %vm2413_vm6, %v2412_v57, %v2247_v49 }
 0x6f5   :  { %2771 = vrsqrt.f32 %v2414_v26  ;;  %vm2422_vm8 = vcmp.eq.f32.partialorder %v2414_v26, inf  ;;  %v2425_v43 = vand.u32 2147483648, %v2414_v26  ;;  %vm2424_vm9 = vcmp.eq.f32.partialorder %v2414_v26, 0.0 }
 0x6fb   :  { %v2772_v52 = vpop.eup %2771 }
 0x6fc   :  { %v2416_v21 = vmul.f32 %v2772_v52, %v2414_v26 }
 0x6fe   :  { %v2417_v3 = vmul.f32 %v2772_v52, %v2416_v21 }
 0x700   :  { %v2418_v56 = vmul.f32 0.5, %v2417_v3 }
 0x702   :  { %v2419_v38 = vsub.f32 1.5, %v2418_v56 }
 0x704   :  { %v2420_v55 = vmul.f32 %v2772_v52, %v2419_v38 }
 0x706   :  { %v2421_v61 = vmul.f32 %v2420_v55, %v2414_v26 }
 0x708   :  { %v2423_v59 = vsel %vm2422_vm8, %v2414_v26, %v2421_v61 }
 0x709   :  { %v2426_v18 = vsel %vm2424_vm9, %v2425_v43, %v2423_v59 }
 0x70a   :  { %2428 = vst.msk [vmem:[%s3606_s11] sm:$0xf] %vm2427_vm7, %v2426_v18 }

</bundles_post_ra>
